<compile_context>
chip_gen: v7x
topology: tpu7x:2x2x1
jax: 0.10.0
libtpu: 0.0.40
codegen_flags: <defaults>
</compile_context>

<pallas_src>
import functools

import jax
import jax.numpy as jnp
from jax.experimental import pallas as pl
from jax.experimental.pallas import tpu as pltpu


def _bert_embeddings_kernel(
    ids_ref,     # SMEM (N,) int32     -- scalar-prefetched word ids (flattened)
    tt_ref,      # VMEM (TS, 1) int32  -- token-type ids for this token tile
    pos_ref,     # VMEM (S, H)         -- rows 0..S-1 of the position table
    type_ref,    # VMEM (T, H)         -- token-type table
    gb_ref,      # VMEM (2, H)         -- row 0 = gamma, row 1 = beta
    word_hbm,    # HBM  (V, H)         -- word table, memory_space=pl.ANY
    out_ref,     # VMEM (TS, H)
    wbuf,        # VMEM (TS, H) scratch -- gathered word-embedding rows
    sem,         # DMA semaphores (TS,)
    *,
    eps,
    seq_len,
):
    TS, H = out_ref.shape
    S = seq_len
    T = type_ref.shape[0]
    R = TS // S                      # token tile covers R full sequences
    base = pl.program_id(0) * TS     # first flattened token row of this tile

    # ---- word embeddings: per-token row gather from the HBM table ----------
    # TS is small/static here, so issue all row DMAs up front (the DMA engine
    # overlaps the transfers), then wait.  ids live in SMEM -> addressing is
    # pure scalar-unit work, no vector loads spent on indices.
    for r in range(TS):
        tok = ids_ref[base + r]
        pltpu.make_async_copy(
            word_hbm.at[pl.ds(tok, 1), :],
            wbuf.at[pl.ds(r, 1), :],
            sem.at[r],
        ).start()
    for r in range(TS):
        pltpu.make_async_copy(
            word_hbm.at[pl.ds(0, 1), :],
            wbuf.at[pl.ds(r, 1), :],
            sem.at[r],
        ).wait()
    w = wbuf[...].astype(jnp.float32)                        # (TS, H)

    # ---- token-type embeddings ---------------------------------------------
    tts = tt_ref[...]                                        # (TS, 1) int32
    if T == 2:
        # Single VPU select instead of compare/mul/accumulate chain.
        t = jnp.where(
            tts == 0,
            type_ref[pl.ds(0, 1), :].astype(jnp.float32),
            type_ref[pl.ds(1, 1), :].astype(jnp.float32),
        )                                                    # (TS, H)
    else:
        t = jnp.zeros((TS, H), jnp.float32)
        for k in range(T):
            t = t + jnp.where(tts == k, 1.0, 0.0) * type_ref[
                pl.ds(k, 1), :
            ].astype(jnp.float32)

    # ---- position embeddings: contiguous rows 0..S-1, replicated R times ---
    p = pos_ref[...].astype(jnp.float32)                     # (S, H)
    if R > 1:
        p = jnp.concatenate([p] * R, axis=0)                 # (TS, H), static
    x = w + t + p                                            # (TS, H) f32

    # ---- LayerNorm (fused one-pass statistics, all in f32) ------------------
    inv_h = 1.0 / H
    s1 = jnp.sum(x, axis=-1, keepdims=True)
    s2 = jnp.sum(x * x, axis=-1, keepdims=True)
    mean = s1 * inv_h
    var = s2 * inv_h - mean * mean
    y = (x - mean) * jax.lax.rsqrt(var + eps)
    y = y * gb_ref[pl.ds(0, 1), :] + gb_ref[pl.ds(1, 1), :]  # gamma, beta

    # Single full-tile, lane/sublane-dense store.
    out_ref[...] = y.astype(out_ref.dtype)


def bert_embeddings(
    input_ids,          # (B, S) int32
    token_type_ids,     # (B, S) int32
    word_emb,           # (V, H) f32
    pos_emb,            # (P, H) f32,  S <= P
    type_emb,           # (T, H) f32
    gamma,              # (H,)  f32
    beta,               # (H,)  f32
    *,
    eps=1e-12,
    token_tile=None,
):
    B, S = input_ids.shape
    V, H = word_emb.shape
    T = type_emb.shape[0]
    N = B * S
    if token_tile is None:
        token_tile = N                      # one grid step for small problems
    TS = token_tile

    assert S <= pos_emb.shape[0], "sequence length exceeds max_position_embeddings"
    assert N % TS == 0, "token tile must divide B*S"
    assert TS % S == 0, "token tile must cover whole sequences (positions repeat)"
    assert TS % 8 == 0 and H % 128 == 0, "tiles must be (8,128)-aligned"

    # Flattened ids -> SMEM scalar prefetch (drives the DMA gather addressing).
    ids_flat = input_ids.astype(jnp.int32).reshape(N)
    # Token-type ids as (N, 1) so the kernel sees a (TS, 1) vreg (no transpose).
    tt2 = token_type_ids.astype(jnp.int32).reshape(N, 1)
    # Default position_ids = arange(S): just the first S table rows.
    pos_slice = pos_emb[:S]
    # Fold gamma/beta into one (2, H) operand (one fewer DMA'd operand).
    gb = jnp.stack([gamma, beta], axis=0)

    kernel = functools.partial(_bert_embeddings_kernel, eps=eps, seq_len=S)

    out_flat = pl.pallas_call(
        kernel,
        out_shape=jax.ShapeDtypeStruct((N, H), jnp.float32),
        grid_spec=pltpu.PrefetchScalarGridSpec(
            num_scalar_prefetch=1,                     # ids -> SMEM
            grid=(N // TS,),
            in_specs=[
                pl.BlockSpec((TS, 1), lambda i, ids: (i, 0)),   # token types
                pl.BlockSpec((S, H), lambda i, ids: (0, 0)),    # pos rows 0..S-1
                pl.BlockSpec((T, H), lambda i, ids: (0, 0)),    # type table
                pl.BlockSpec((2, H), lambda i, ids: (0, 0)),    # gamma/beta
                pl.BlockSpec(memory_space=pl.ANY),              # word table (HBM)
            ],
            out_specs=pl.BlockSpec((TS, H), lambda i, ids: (i, 0)),
            scratch_shapes=[
                pltpu.VMEM((TS, H), word_emb.dtype),            # gathered rows
                pltpu.SemaphoreType.DMA((TS,)),                 # per-row DMA sems
            ],
        ),
        compiler_params=pltpu.CompilerParams(
            # Token tiles are independent -> shard across v7x TensorCores.
            dimension_semantics=("parallel",),
            vmem_limit_bytes=32 * 1024 * 1024,
        ),
    )(ids_flat, tt2, pos_slice, type_emb, gb, word_emb)

    return out_flat.reshape(B, S, H)


def _reference(input_ids, token_type_ids, word_emb, pos_emb, type_emb, gamma, beta, eps):
    B, S = input_ids.shape
    pos_ids = jnp.broadcast_to(jnp.arange(S, dtype=jnp.int32)[None, :], (B, S))
    w = word_emb[input_ids]
    p = pos_emb[pos_ids]
    t = type_emb[token_type_ids]
    x = w + p + t
    mean = jnp.mean(x, axis=-1, keepdims=True)
    var = jnp.mean((x - mean) ** 2, axis=-1, keepdims=True)
    y = (x - mean) / jnp.sqrt(var + eps)
    return y * gamma + beta


if __name__ == "__main__":
    # Synthetic "config": vocab_size=64, max_position_embeddings=16,
    # type_vocab_size=2, hidden_size=128, layer_norm_eps=1e-12.
    VOCAB, MAX_POS, TYPE_VOCAB, HIDDEN = 64, 16, 2, 128
    B, S = 2, 8
    EPS = 1e-12

    key = jax.random.PRNGKey(0)
    k_w, k_p, k_t, k_ids, k_tt = jax.random.split(key, 5)

    word_emb = (0.02 * jax.random.normal(k_w, (VOCAB, HIDDEN))).astype(jnp.float32)
    pos_emb = (0.02 * jax.random.normal(k_p, (MAX_POS, HIDDEN))).astype(jnp.float32)
    type_emb = (0.02 * jax.random.normal(k_t, (TYPE_VOCAB, HIDDEN))).astype(jnp.float32)
    gamma = jnp.ones((HIDDEN,), jnp.float32)
    beta = jnp.zeros((HIDDEN,), jnp.float32)

    input_ids = jax.random.randint(k_ids, (B, S), 0, VOCAB, dtype=jnp.int32)
    token_type_ids = jax.random.randint(k_tt, (B, S), 0, TYPE_VOCAB, dtype=jnp.int32)

    out = bert_embeddings(
        input_ids, token_type_ids, word_emb, pos_emb, type_emb, gamma, beta, eps=EPS
    )
    out = jax.block_until_ready(out)

    ref = _reference(
        input_ids, token_type_ids, word_emb, pos_emb, type_emb, gamma, beta, EPS
    )
    assert out.shape == (B, S, HIDDEN)
    assert jnp.allclose(out, ref, atol=1e-5, rtol=1e-5), "mismatch vs reference"

    print("KERNEL_OK")
</pallas_src>

<mosaic_0001>
module attributes {stable_mosaic.version = 11 : i64} {
  func.func @_bert_embeddings_kernel(%arg0: i32, %arg1: memref<16xi32, #tpu.memory_space<smem>>, %arg2: memref<16x1xi32, #tpu.memory_space<vmem>>, %arg3: memref<8x128xf32, #tpu.memory_space<vmem>>, %arg4: memref<2x128xf32, #tpu.memory_space<vmem>>, %arg5: memref<2x128xf32, #tpu.memory_space<vmem>>, %arg6: memref<64x128xf32, #tpu.memory_space<any>>, %arg7: memref<16x128xf32, #tpu.memory_space<vmem>>, %arg8: memref<16x128xf32, #tpu.memory_space<vmem>>, %arg9: memref<16x!tpu.dma_semaphore, #tpu.memory_space<semaphore_mem>>) attributes {dimension_semantics = [#tpu.dimension_semantics<parallel>], iteration_bounds = array<i64: 1>, scalar_prefetch = 1 : i64, scratch_operands = 2 : i64, tpu.core_type = #tpu.core_type<tc>, window_params = [{transform_indices = @transform_0, window_bounds = array<i64: 16, 1>}, {pipeline_mode = #tpu.pipeline_mode<synchronous>, transform_indices = @transform_1, window_bounds = array<i64: 8, 128>}, {pipeline_mode = #tpu.pipeline_mode<synchronous>, transform_indices = @transform_2, window_bounds = array<i64: 2, 128>}, {pipeline_mode = #tpu.pipeline_mode<synchronous>, transform_indices = @transform_3, window_bounds = array<i64: 2, 128>}, {}, {transform_indices = @transform_5, window_bounds = array<i64: 16, 128>}]} {
    %c16_i32 = arith.constant 16 : i32
    %0 = arith.muli %arg0, %c16_i32 : i32
    %c0_i32 = arith.constant 0 : i32
    %1 = arith.addi %0, %c0_i32 : i32
    %2 = arith.index_cast %1 : i32 to index
    %3 = memref.load %arg1[%2] : memref<16xi32, #tpu.memory_space<smem>>
    %c0_i32_0 = arith.constant 0 : i32
    %c0_i32_1 = arith.constant 0 : i32
    %4 = tpu.memref_slice %arg6[%3, %c0_i32_1] : memref<64x128xf32, #tpu.memory_space<any>> -> memref<1x128xf32, #tpu.memory_space<any>>
    %c0_i32_2 = arith.constant 0 : i32
    %c0_i32_3 = arith.constant 0 : i32
    %5 = tpu.memref_slice %arg8[%c0_i32_2, %c0_i32_3] : memref<16x128xf32, #tpu.memory_space<vmem>> -> memref<1x128xf32, #tpu.memory_space<vmem>>
    %6 = tpu.memref_slice %arg9[%c0_i32_0] : memref<16x!tpu.dma_semaphore, #tpu.memory_space<semaphore_mem>> -> memref<1x!tpu.dma_semaphore, #tpu.memory_space<semaphore_mem>>
    %7 = tpu.memref_squeeze %6 : memref<1x!tpu.dma_semaphore, #tpu.memory_space<semaphore_mem>> -> memref<!tpu.dma_semaphore, #tpu.memory_space<semaphore_mem>>
    tpu.enqueue_dma source(%4 : memref<1x128xf32, #tpu.memory_space<any>>) target(%5 : memref<1x128xf32, #tpu.memory_space<vmem>>) target_semaphore(%7 : memref<!tpu.dma_semaphore, #tpu.memory_space<semaphore_mem>>)
    %c1_i32 = arith.constant 1 : i32
    %8 = arith.addi %0, %c1_i32 : i32
    %9 = arith.index_cast %8 : i32 to index
    %10 = memref.load %arg1[%9] : memref<16xi32, #tpu.memory_space<smem>>
    %c1_i32_4 = arith.constant 1 : i32
    %c0_i32_5 = arith.constant 0 : i32
    %11 = tpu.memref_slice %arg6[%10, %c0_i32_5] : memref<64x128xf32, #tpu.memory_space<any>> -> memref<1x128xf32, #tpu.memory_space<any>>
    %c1_i32_6 = arith.constant 1 : i32
    %c0_i32_7 = arith.constant 0 : i32
    %12 = tpu.memref_slice %arg8[%c1_i32_6, %c0_i32_7] : memref<16x128xf32, #tpu.memory_space<vmem>> -> memref<1x128xf32, #tpu.memory_space<vmem>>
    %13 = tpu.memref_slice %arg9[%c1_i32_4] : memref<16x!tpu.dma_semaphore, #tpu.memory_space<semaphore_mem>> -> memref<1x!tpu.dma_semaphore, #tpu.memory_space<semaphore_mem>>
    %14 = tpu.memref_squeeze %13 : memref<1x!tpu.dma_semaphore, #tpu.memory_space<semaphore_mem>> -> memref<!tpu.dma_semaphore, #tpu.memory_space<semaphore_mem>>
    tpu.enqueue_dma source(%11 : memref<1x128xf32, #tpu.memory_space<any>>) target(%12 : memref<1x128xf32, #tpu.memory_space<vmem>>) target_semaphore(%14 : memref<!tpu.dma_semaphore, #tpu.memory_space<semaphore_mem>>)
    %c2_i32 = arith.constant 2 : i32
    %15 = arith.addi %0, %c2_i32 : i32
    %16 = arith.index_cast %15 : i32 to index
    %17 = memref.load %arg1[%16] : memref<16xi32, #tpu.memory_space<smem>>
    %c2_i32_8 = arith.constant 2 : i32
    %c0_i32_9 = arith.constant 0 : i32
    %18 = tpu.memref_slice %arg6[%17, %c0_i32_9] : memref<64x128xf32, #tpu.memory_space<any>> -> memref<1x128xf32, #tpu.memory_space<any>>
    %c2_i32_10 = arith.constant 2 : i32
    %c0_i32_11 = arith.constant 0 : i32
    %19 = tpu.memref_slice %arg8[%c2_i32_10, %c0_i32_11] : memref<16x128xf32, #tpu.memory_space<vmem>> -> memref<1x128xf32, #tpu.memory_space<vmem>>
    %20 = tpu.memref_slice %arg9[%c2_i32_8] : memref<16x!tpu.dma_semaphore, #tpu.memory_space<semaphore_mem>> -> memref<1x!tpu.dma_semaphore, #tpu.memory_space<semaphore_mem>>
    %21 = tpu.memref_squeeze %20 : memref<1x!tpu.dma_semaphore, #tpu.memory_space<semaphore_mem>> -> memref<!tpu.dma_semaphore, #tpu.memory_space<semaphore_mem>>
    tpu.enqueue_dma source(%18 : memref<1x128xf32, #tpu.memory_space<any>>) target(%19 : memref<1x128xf32, #tpu.memory_space<vmem>>) target_semaphore(%21 : memref<!tpu.dma_semaphore, #tpu.memory_space<semaphore_mem>>)
    %c3_i32 = arith.constant 3 : i32
    %22 = arith.addi %0, %c3_i32 : i32
    %23 = arith.index_cast %22 : i32 to index
    %24 = memref.load %arg1[%23] : memref<16xi32, #tpu.memory_space<smem>>
    %c3_i32_12 = arith.constant 3 : i32
    %c0_i32_13 = arith.constant 0 : i32
    %25 = tpu.memref_slice %arg6[%24, %c0_i32_13] : memref<64x128xf32, #tpu.memory_space<any>> -> memref<1x128xf32, #tpu.memory_space<any>>
    %c3_i32_14 = arith.constant 3 : i32
    %c0_i32_15 = arith.constant 0 : i32
    %26 = tpu.memref_slice %arg8[%c3_i32_14, %c0_i32_15] : memref<16x128xf32, #tpu.memory_space<vmem>> -> memref<1x128xf32, #tpu.memory_space<vmem>>
    %27 = tpu.memref_slice %arg9[%c3_i32_12] : memref<16x!tpu.dma_semaphore, #tpu.memory_space<semaphore_mem>> -> memref<1x!tpu.dma_semaphore, #tpu.memory_space<semaphore_mem>>
    %28 = tpu.memref_squeeze %27 : memref<1x!tpu.dma_semaphore, #tpu.memory_space<semaphore_mem>> -> memref<!tpu.dma_semaphore, #tpu.memory_space<semaphore_mem>>
    tpu.enqueue_dma source(%25 : memref<1x128xf32, #tpu.memory_space<any>>) target(%26 : memref<1x128xf32, #tpu.memory_space<vmem>>) target_semaphore(%28 : memref<!tpu.dma_semaphore, #tpu.memory_space<semaphore_mem>>)
    %c4_i32 = arith.constant 4 : i32
    %29 = arith.addi %0, %c4_i32 : i32
    %30 = arith.index_cast %29 : i32 to index
    %31 = memref.load %arg1[%30] : memref<16xi32, #tpu.memory_space<smem>>
    %c4_i32_16 = arith.constant 4 : i32
    %c0_i32_17 = arith.constant 0 : i32
    %32 = tpu.memref_slice %arg6[%31, %c0_i32_17] : memref<64x128xf32, #tpu.memory_space<any>> -> memref<1x128xf32, #tpu.memory_space<any>>
    %c4_i32_18 = arith.constant 4 : i32
    %c0_i32_19 = arith.constant 0 : i32
    %33 = tpu.memref_slice %arg8[%c4_i32_18, %c0_i32_19] : memref<16x128xf32, #tpu.memory_space<vmem>> -> memref<1x128xf32, #tpu.memory_space<vmem>>
    %34 = tpu.memref_slice %arg9[%c4_i32_16] : memref<16x!tpu.dma_semaphore, #tpu.memory_space<semaphore_mem>> -> memref<1x!tpu.dma_semaphore, #tpu.memory_space<semaphore_mem>>
    %35 = tpu.memref_squeeze %34 : memref<1x!tpu.dma_semaphore, #tpu.memory_space<semaphore_mem>> -> memref<!tpu.dma_semaphore, #tpu.memory_space<semaphore_mem>>
    tpu.enqueue_dma source(%32 : memref<1x128xf32, #tpu.memory_space<any>>) target(%33 : memref<1x128xf32, #tpu.memory_space<vmem>>) target_semaphore(%35 : memref<!tpu.dma_semaphore, #tpu.memory_space<semaphore_mem>>)
    %c5_i32 = arith.constant 5 : i32
    %36 = arith.addi %0, %c5_i32 : i32
    %37 = arith.index_cast %36 : i32 to index
    %38 = memref.load %arg1[%37] : memref<16xi32, #tpu.memory_space<smem>>
    %c5_i32_20 = arith.constant 5 : i32
    %c0_i32_21 = arith.constant 0 : i32
    %39 = tpu.memref_slice %arg6[%38, %c0_i32_21] : memref<64x128xf32, #tpu.memory_space<any>> -> memref<1x128xf32, #tpu.memory_space<any>>
    %c5_i32_22 = arith.constant 5 : i32
    %c0_i32_23 = arith.constant 0 : i32
    %40 = tpu.memref_slice %arg8[%c5_i32_22, %c0_i32_23] : memref<16x128xf32, #tpu.memory_space<vmem>> -> memref<1x128xf32, #tpu.memory_space<vmem>>
    %41 = tpu.memref_slice %arg9[%c5_i32_20] : memref<16x!tpu.dma_semaphore, #tpu.memory_space<semaphore_mem>> -> memref<1x!tpu.dma_semaphore, #tpu.memory_space<semaphore_mem>>
    %42 = tpu.memref_squeeze %41 : memref<1x!tpu.dma_semaphore, #tpu.memory_space<semaphore_mem>> -> memref<!tpu.dma_semaphore, #tpu.memory_space<semaphore_mem>>
    tpu.enqueue_dma source(%39 : memref<1x128xf32, #tpu.memory_space<any>>) target(%40 : memref<1x128xf32, #tpu.memory_space<vmem>>) target_semaphore(%42 : memref<!tpu.dma_semaphore, #tpu.memory_space<semaphore_mem>>)
    %c6_i32 = arith.constant 6 : i32
    %43 = arith.addi %0, %c6_i32 : i32
    %44 = arith.index_cast %43 : i32 to index
    %45 = memref.load %arg1[%44] : memref<16xi32, #tpu.memory_space<smem>>
    %c6_i32_24 = arith.constant 6 : i32
    %c0_i32_25 = arith.constant 0 : i32
    %46 = tpu.memref_slice %arg6[%45, %c0_i32_25] : memref<64x128xf32, #tpu.memory_space<any>> -> memref<1x128xf32, #tpu.memory_space<any>>
    %c6_i32_26 = arith.constant 6 : i32
    %c0_i32_27 = arith.constant 0 : i32
    %47 = tpu.memref_slice %arg8[%c6_i32_26, %c0_i32_27] : memref<16x128xf32, #tpu.memory_space<vmem>> -> memref<1x128xf32, #tpu.memory_space<vmem>>
    %48 = tpu.memref_slice %arg9[%c6_i32_24] : memref<16x!tpu.dma_semaphore, #tpu.memory_space<semaphore_mem>> -> memref<1x!tpu.dma_semaphore, #tpu.memory_space<semaphore_mem>>
    %49 = tpu.memref_squeeze %48 : memref<1x!tpu.dma_semaphore, #tpu.memory_space<semaphore_mem>> -> memref<!tpu.dma_semaphore, #tpu.memory_space<semaphore_mem>>
    tpu.enqueue_dma source(%46 : memref<1x128xf32, #tpu.memory_space<any>>) target(%47 : memref<1x128xf32, #tpu.memory_space<vmem>>) target_semaphore(%49 : memref<!tpu.dma_semaphore, #tpu.memory_space<semaphore_mem>>)
    %c7_i32 = arith.constant 7 : i32
    %50 = arith.addi %0, %c7_i32 : i32
    %51 = arith.index_cast %50 : i32 to index
    %52 = memref.load %arg1[%51] : memref<16xi32, #tpu.memory_space<smem>>
    %c7_i32_28 = arith.constant 7 : i32
    %c0_i32_29 = arith.constant 0 : i32
    %53 = tpu.memref_slice %arg6[%52, %c0_i32_29] : memref<64x128xf32, #tpu.memory_space<any>> -> memref<1x128xf32, #tpu.memory_space<any>>
    %c7_i32_30 = arith.constant 7 : i32
    %c0_i32_31 = arith.constant 0 : i32
    %54 = tpu.memref_slice %arg8[%c7_i32_30, %c0_i32_31] : memref<16x128xf32, #tpu.memory_space<vmem>> -> memref<1x128xf32, #tpu.memory_space<vmem>>
    %55 = tpu.memref_slice %arg9[%c7_i32_28] : memref<16x!tpu.dma_semaphore, #tpu.memory_space<semaphore_mem>> -> memref<1x!tpu.dma_semaphore, #tpu.memory_space<semaphore_mem>>
    %56 = tpu.memref_squeeze %55 : memref<1x!tpu.dma_semaphore, #tpu.memory_space<semaphore_mem>> -> memref<!tpu.dma_semaphore, #tpu.memory_space<semaphore_mem>>
    tpu.enqueue_dma source(%53 : memref<1x128xf32, #tpu.memory_space<any>>) target(%54 : memref<1x128xf32, #tpu.memory_space<vmem>>) target_semaphore(%56 : memref<!tpu.dma_semaphore, #tpu.memory_space<semaphore_mem>>)
    %c8_i32 = arith.constant 8 : i32
    %57 = arith.addi %0, %c8_i32 : i32
    %58 = arith.index_cast %57 : i32 to index
    %59 = memref.load %arg1[%58] : memref<16xi32, #tpu.memory_space<smem>>
    %c8_i32_32 = arith.constant 8 : i32
    %c0_i32_33 = arith.constant 0 : i32
    %60 = tpu.memref_slice %arg6[%59, %c0_i32_33] : memref<64x128xf32, #tpu.memory_space<any>> -> memref<1x128xf32, #tpu.memory_space<any>>
    %c8_i32_34 = arith.constant 8 : i32
    %c0_i32_35 = arith.constant 0 : i32
    %61 = tpu.memref_slice %arg8[%c8_i32_34, %c0_i32_35] : memref<16x128xf32, #tpu.memory_space<vmem>> -> memref<1x128xf32, #tpu.memory_space<vmem>>
    %62 = tpu.memref_slice %arg9[%c8_i32_32] : memref<16x!tpu.dma_semaphore, #tpu.memory_space<semaphore_mem>> -> memref<1x!tpu.dma_semaphore, #tpu.memory_space<semaphore_mem>>
    %63 = tpu.memref_squeeze %62 : memref<1x!tpu.dma_semaphore, #tpu.memory_space<semaphore_mem>> -> memref<!tpu.dma_semaphore, #tpu.memory_space<semaphore_mem>>
    tpu.enqueue_dma source(%60 : memref<1x128xf32, #tpu.memory_space<any>>) target(%61 : memref<1x128xf32, #tpu.memory_space<vmem>>) target_semaphore(%63 : memref<!tpu.dma_semaphore, #tpu.memory_space<semaphore_mem>>)
    %c9_i32 = arith.constant 9 : i32
    %64 = arith.addi %0, %c9_i32 : i32
    %65 = arith.index_cast %64 : i32 to index
    %66 = memref.load %arg1[%65] : memref<16xi32, #tpu.memory_space<smem>>
    %c9_i32_36 = arith.constant 9 : i32
    %c0_i32_37 = arith.constant 0 : i32
    %67 = tpu.memref_slice %arg6[%66, %c0_i32_37] : memref<64x128xf32, #tpu.memory_space<any>> -> memref<1x128xf32, #tpu.memory_space<any>>
    %c9_i32_38 = arith.constant 9 : i32
    %c0_i32_39 = arith.constant 0 : i32
    %68 = tpu.memref_slice %arg8[%c9_i32_38, %c0_i32_39] : memref<16x128xf32, #tpu.memory_space<vmem>> -> memref<1x128xf32, #tpu.memory_space<vmem>>
    %69 = tpu.memref_slice %arg9[%c9_i32_36] : memref<16x!tpu.dma_semaphore, #tpu.memory_space<semaphore_mem>> -> memref<1x!tpu.dma_semaphore, #tpu.memory_space<semaphore_mem>>
    %70 = tpu.memref_squeeze %69 : memref<1x!tpu.dma_semaphore, #tpu.memory_space<semaphore_mem>> -> memref<!tpu.dma_semaphore, #tpu.memory_space<semaphore_mem>>
    tpu.enqueue_dma source(%67 : memref<1x128xf32, #tpu.memory_space<any>>) target(%68 : memref<1x128xf32, #tpu.memory_space<vmem>>) target_semaphore(%70 : memref<!tpu.dma_semaphore, #tpu.memory_space<semaphore_mem>>)
    %c10_i32 = arith.constant 10 : i32
    %71 = arith.addi %0, %c10_i32 : i32
    %72 = arith.index_cast %71 : i32 to index
    %73 = memref.load %arg1[%72] : memref<16xi32, #tpu.memory_space<smem>>
    %c10_i32_40 = arith.constant 10 : i32
    %c0_i32_41 = arith.constant 0 : i32
    %74 = tpu.memref_slice %arg6[%73, %c0_i32_41] : memref<64x128xf32, #tpu.memory_space<any>> -> memref<1x128xf32, #tpu.memory_space<any>>
    %c10_i32_42 = arith.constant 10 : i32
    %c0_i32_43 = arith.constant 0 : i32
    %75 = tpu.memref_slice %arg8[%c10_i32_42, %c0_i32_43] : memref<16x128xf32, #tpu.memory_space<vmem>> -> memref<1x128xf32, #tpu.memory_space<vmem>>
    %76 = tpu.memref_slice %arg9[%c10_i32_40] : memref<16x!tpu.dma_semaphore, #tpu.memory_space<semaphore_mem>> -> memref<1x!tpu.dma_semaphore, #tpu.memory_space<semaphore_mem>>
    %77 = tpu.memref_squeeze %76 : memref<1x!tpu.dma_semaphore, #tpu.memory_space<semaphore_mem>> -> memref<!tpu.dma_semaphore, #tpu.memory_space<semaphore_mem>>
    tpu.enqueue_dma source(%74 : memref<1x128xf32, #tpu.memory_space<any>>) target(%75 : memref<1x128xf32, #tpu.memory_space<vmem>>) target_semaphore(%77 : memref<!tpu.dma_semaphore, #tpu.memory_space<semaphore_mem>>)
    %c11_i32 = arith.constant 11 : i32
    %78 = arith.addi %0, %c11_i32 : i32
    %79 = arith.index_cast %78 : i32 to index
    %80 = memref.load %arg1[%79] : memref<16xi32, #tpu.memory_space<smem>>
    %c11_i32_44 = arith.constant 11 : i32
    %c0_i32_45 = arith.constant 0 : i32
    %81 = tpu.memref_slice %arg6[%80, %c0_i32_45] : memref<64x128xf32, #tpu.memory_space<any>> -> memref<1x128xf32, #tpu.memory_space<any>>
    %c11_i32_46 = arith.constant 11 : i32
    %c0_i32_47 = arith.constant 0 : i32
    %82 = tpu.memref_slice %arg8[%c11_i32_46, %c0_i32_47] : memref<16x128xf32, #tpu.memory_space<vmem>> -> memref<1x128xf32, #tpu.memory_space<vmem>>
    %83 = tpu.memref_slice %arg9[%c11_i32_44] : memref<16x!tpu.dma_semaphore, #tpu.memory_space<semaphore_mem>> -> memref<1x!tpu.dma_semaphore, #tpu.memory_space<semaphore_mem>>
    %84 = tpu.memref_squeeze %83 : memref<1x!tpu.dma_semaphore, #tpu.memory_space<semaphore_mem>> -> memref<!tpu.dma_semaphore, #tpu.memory_space<semaphore_mem>>
    tpu.enqueue_dma source(%81 : memref<1x128xf32, #tpu.memory_space<any>>) target(%82 : memref<1x128xf32, #tpu.memory_space<vmem>>) target_semaphore(%84 : memref<!tpu.dma_semaphore, #tpu.memory_space<semaphore_mem>>)
    %c12_i32 = arith.constant 12 : i32
    %85 = arith.addi %0, %c12_i32 : i32
    %86 = arith.index_cast %85 : i32 to index
    %87 = memref.load %arg1[%86] : memref<16xi32, #tpu.memory_space<smem>>
    %c12_i32_48 = arith.constant 12 : i32
    %c0_i32_49 = arith.constant 0 : i32
    %88 = tpu.memref_slice %arg6[%87, %c0_i32_49] : memref<64x128xf32, #tpu.memory_space<any>> -> memref<1x128xf32, #tpu.memory_space<any>>
    %c12_i32_50 = arith.constant 12 : i32
    %c0_i32_51 = arith.constant 0 : i32
    %89 = tpu.memref_slice %arg8[%c12_i32_50, %c0_i32_51] : memref<16x128xf32, #tpu.memory_space<vmem>> -> memref<1x128xf32, #tpu.memory_space<vmem>>
    %90 = tpu.memref_slice %arg9[%c12_i32_48] : memref<16x!tpu.dma_semaphore, #tpu.memory_space<semaphore_mem>> -> memref<1x!tpu.dma_semaphore, #tpu.memory_space<semaphore_mem>>
    %91 = tpu.memref_squeeze %90 : memref<1x!tpu.dma_semaphore, #tpu.memory_space<semaphore_mem>> -> memref<!tpu.dma_semaphore, #tpu.memory_space<semaphore_mem>>
    tpu.enqueue_dma source(%88 : memref<1x128xf32, #tpu.memory_space<any>>) target(%89 : memref<1x128xf32, #tpu.memory_space<vmem>>) target_semaphore(%91 : memref<!tpu.dma_semaphore, #tpu.memory_space<semaphore_mem>>)
    %c13_i32 = arith.constant 13 : i32
    %92 = arith.addi %0, %c13_i32 : i32
    %93 = arith.index_cast %92 : i32 to index
    %94 = memref.load %arg1[%93] : memref<16xi32, #tpu.memory_space<smem>>
    %c13_i32_52 = arith.constant 13 : i32
    %c0_i32_53 = arith.constant 0 : i32
    %95 = tpu.memref_slice %arg6[%94, %c0_i32_53] : memref<64x128xf32, #tpu.memory_space<any>> -> memref<1x128xf32, #tpu.memory_space<any>>
    %c13_i32_54 = arith.constant 13 : i32
    %c0_i32_55 = arith.constant 0 : i32
    %96 = tpu.memref_slice %arg8[%c13_i32_54, %c0_i32_55] : memref<16x128xf32, #tpu.memory_space<vmem>> -> memref<1x128xf32, #tpu.memory_space<vmem>>
    %97 = tpu.memref_slice %arg9[%c13_i32_52] : memref<16x!tpu.dma_semaphore, #tpu.memory_space<semaphore_mem>> -> memref<1x!tpu.dma_semaphore, #tpu.memory_space<semaphore_mem>>
    %98 = tpu.memref_squeeze %97 : memref<1x!tpu.dma_semaphore, #tpu.memory_space<semaphore_mem>> -> memref<!tpu.dma_semaphore, #tpu.memory_space<semaphore_mem>>
    tpu.enqueue_dma source(%95 : memref<1x128xf32, #tpu.memory_space<any>>) target(%96 : memref<1x128xf32, #tpu.memory_space<vmem>>) target_semaphore(%98 : memref<!tpu.dma_semaphore, #tpu.memory_space<semaphore_mem>>)
    %c14_i32 = arith.constant 14 : i32
    %99 = arith.addi %0, %c14_i32 : i32
    %100 = arith.index_cast %99 : i32 to index
    %101 = memref.load %arg1[%100] : memref<16xi32, #tpu.memory_space<smem>>
    %c14_i32_56 = arith.constant 14 : i32
    %c0_i32_57 = arith.constant 0 : i32
    %102 = tpu.memref_slice %arg6[%101, %c0_i32_57] : memref<64x128xf32, #tpu.memory_space<any>> -> memref<1x128xf32, #tpu.memory_space<any>>
    %c14_i32_58 = arith.constant 14 : i32
    %c0_i32_59 = arith.constant 0 : i32
    %103 = tpu.memref_slice %arg8[%c14_i32_58, %c0_i32_59] : memref<16x128xf32, #tpu.memory_space<vmem>> -> memref<1x128xf32, #tpu.memory_space<vmem>>
    %104 = tpu.memref_slice %arg9[%c14_i32_56] : memref<16x!tpu.dma_semaphore, #tpu.memory_space<semaphore_mem>> -> memref<1x!tpu.dma_semaphore, #tpu.memory_space<semaphore_mem>>
    %105 = tpu.memref_squeeze %104 : memref<1x!tpu.dma_semaphore, #tpu.memory_space<semaphore_mem>> -> memref<!tpu.dma_semaphore, #tpu.memory_space<semaphore_mem>>
    tpu.enqueue_dma source(%102 : memref<1x128xf32, #tpu.memory_space<any>>) target(%103 : memref<1x128xf32, #tpu.memory_space<vmem>>) target_semaphore(%105 : memref<!tpu.dma_semaphore, #tpu.memory_space<semaphore_mem>>)
    %c15_i32 = arith.constant 15 : i32
    %106 = arith.addi %0, %c15_i32 : i32
    %107 = arith.index_cast %106 : i32 to index
    %108 = memref.load %arg1[%107] : memref<16xi32, #tpu.memory_space<smem>>
    %c15_i32_60 = arith.constant 15 : i32
    %c0_i32_61 = arith.constant 0 : i32
    %109 = tpu.memref_slice %arg6[%108, %c0_i32_61] : memref<64x128xf32, #tpu.memory_space<any>> -> memref<1x128xf32, #tpu.memory_space<any>>
    %c15_i32_62 = arith.constant 15 : i32
    %c0_i32_63 = arith.constant 0 : i32
    %110 = tpu.memref_slice %arg8[%c15_i32_62, %c0_i32_63] : memref<16x128xf32, #tpu.memory_space<vmem>> -> memref<1x128xf32, #tpu.memory_space<vmem>>
    %111 = tpu.memref_slice %arg9[%c15_i32_60] : memref<16x!tpu.dma_semaphore, #tpu.memory_space<semaphore_mem>> -> memref<1x!tpu.dma_semaphore, #tpu.memory_space<semaphore_mem>>
    %112 = tpu.memref_squeeze %111 : memref<1x!tpu.dma_semaphore, #tpu.memory_space<semaphore_mem>> -> memref<!tpu.dma_semaphore, #tpu.memory_space<semaphore_mem>>
    tpu.enqueue_dma source(%109 : memref<1x128xf32, #tpu.memory_space<any>>) target(%110 : memref<1x128xf32, #tpu.memory_space<vmem>>) target_semaphore(%112 : memref<!tpu.dma_semaphore, #tpu.memory_space<semaphore_mem>>)
    %c0_i32_64 = arith.constant 0 : i32
    %c0_i32_65 = arith.constant 0 : i32
    %c0_i32_66 = arith.constant 0 : i32
    %113 = tpu.memref_slice %arg6[%c0_i32_65, %c0_i32_66] : memref<64x128xf32, #tpu.memory_space<any>> -> memref<1x128xf32, #tpu.memory_space<any>>
    %c0_i32_67 = arith.constant 0 : i32
    %c0_i32_68 = arith.constant 0 : i32
    %114 = tpu.memref_slice %arg8[%c0_i32_67, %c0_i32_68] : memref<16x128xf32, #tpu.memory_space<vmem>> -> memref<1x128xf32, #tpu.memory_space<vmem>>
    %115 = tpu.memref_slice %arg9[%c0_i32_64] : memref<16x!tpu.dma_semaphore, #tpu.memory_space<semaphore_mem>> -> memref<1x!tpu.dma_semaphore, #tpu.memory_space<semaphore_mem>>
    %116 = tpu.memref_squeeze %115 : memref<1x!tpu.dma_semaphore, #tpu.memory_space<semaphore_mem>> -> memref<!tpu.dma_semaphore, #tpu.memory_space<semaphore_mem>>
    tpu.wait_dma2 semaphore(%116 : memref<!tpu.dma_semaphore, #tpu.memory_space<semaphore_mem>>) src(%113 : memref<1x128xf32, #tpu.memory_space<any>>) dst(%114 : memref<1x128xf32, #tpu.memory_space<vmem>>)
    %c1_i32_69 = arith.constant 1 : i32
    %c0_i32_70 = arith.constant 0 : i32
    %c0_i32_71 = arith.constant 0 : i32
    %117 = tpu.memref_slice %arg6[%c0_i32_70, %c0_i32_71] : memref<64x128xf32, #tpu.memory_space<any>> -> memref<1x128xf32, #tpu.memory_space<any>>
    %c1_i32_72 = arith.constant 1 : i32
    %c0_i32_73 = arith.constant 0 : i32
    %118 = tpu.memref_slice %arg8[%c1_i32_72, %c0_i32_73] : memref<16x128xf32, #tpu.memory_space<vmem>> -> memref<1x128xf32, #tpu.memory_space<vmem>>
    %119 = tpu.memref_slice %arg9[%c1_i32_69] : memref<16x!tpu.dma_semaphore, #tpu.memory_space<semaphore_mem>> -> memref<1x!tpu.dma_semaphore, #tpu.memory_space<semaphore_mem>>
    %120 = tpu.memref_squeeze %119 : memref<1x!tpu.dma_semaphore, #tpu.memory_space<semaphore_mem>> -> memref<!tpu.dma_semaphore, #tpu.memory_space<semaphore_mem>>
    tpu.wait_dma2 semaphore(%120 : memref<!tpu.dma_semaphore, #tpu.memory_space<semaphore_mem>>) src(%117 : memref<1x128xf32, #tpu.memory_space<any>>) dst(%118 : memref<1x128xf32, #tpu.memory_space<vmem>>)
    %c2_i32_74 = arith.constant 2 : i32
    %c0_i32_75 = arith.constant 0 : i32
    %c0_i32_76 = arith.constant 0 : i32
    %121 = tpu.memref_slice %arg6[%c0_i32_75, %c0_i32_76] : memref<64x128xf32, #tpu.memory_space<any>> -> memref<1x128xf32, #tpu.memory_space<any>>
    %c2_i32_77 = arith.constant 2 : i32
    %c0_i32_78 = arith.constant 0 : i32
    %122 = tpu.memref_slice %arg8[%c2_i32_77, %c0_i32_78] : memref<16x128xf32, #tpu.memory_space<vmem>> -> memref<1x128xf32, #tpu.memory_space<vmem>>
    %123 = tpu.memref_slice %arg9[%c2_i32_74] : memref<16x!tpu.dma_semaphore, #tpu.memory_space<semaphore_mem>> -> memref<1x!tpu.dma_semaphore, #tpu.memory_space<semaphore_mem>>
    %124 = tpu.memref_squeeze %123 : memref<1x!tpu.dma_semaphore, #tpu.memory_space<semaphore_mem>> -> memref<!tpu.dma_semaphore, #tpu.memory_space<semaphore_mem>>
    tpu.wait_dma2 semaphore(%124 : memref<!tpu.dma_semaphore, #tpu.memory_space<semaphore_mem>>) src(%121 : memref<1x128xf32, #tpu.memory_space<any>>) dst(%122 : memref<1x128xf32, #tpu.memory_space<vmem>>)
    %c3_i32_79 = arith.constant 3 : i32
    %c0_i32_80 = arith.constant 0 : i32
    %c0_i32_81 = arith.constant 0 : i32
    %125 = tpu.memref_slice %arg6[%c0_i32_80, %c0_i32_81] : memref<64x128xf32, #tpu.memory_space<any>> -> memref<1x128xf32, #tpu.memory_space<any>>
    %c3_i32_82 = arith.constant 3 : i32
    %c0_i32_83 = arith.constant 0 : i32
    %126 = tpu.memref_slice %arg8[%c3_i32_82, %c0_i32_83] : memref<16x128xf32, #tpu.memory_space<vmem>> -> memref<1x128xf32, #tpu.memory_space<vmem>>
    %127 = tpu.memref_slice %arg9[%c3_i32_79] : memref<16x!tpu.dma_semaphore, #tpu.memory_space<semaphore_mem>> -> memref<1x!tpu.dma_semaphore, #tpu.memory_space<semaphore_mem>>
    %128 = tpu.memref_squeeze %127 : memref<1x!tpu.dma_semaphore, #tpu.memory_space<semaphore_mem>> -> memref<!tpu.dma_semaphore, #tpu.memory_space<semaphore_mem>>
    tpu.wait_dma2 semaphore(%128 : memref<!tpu.dma_semaphore, #tpu.memory_space<semaphore_mem>>) src(%125 : memref<1x128xf32, #tpu.memory_space<any>>) dst(%126 : memref<1x128xf32, #tpu.memory_space<vmem>>)
    %c4_i32_84 = arith.constant 4 : i32
    %c0_i32_85 = arith.constant 0 : i32
    %c0_i32_86 = arith.constant 0 : i32
    %129 = tpu.memref_slice %arg6[%c0_i32_85, %c0_i32_86] : memref<64x128xf32, #tpu.memory_space<any>> -> memref<1x128xf32, #tpu.memory_space<any>>
    %c4_i32_87 = arith.constant 4 : i32
    %c0_i32_88 = arith.constant 0 : i32
    %130 = tpu.memref_slice %arg8[%c4_i32_87, %c0_i32_88] : memref<16x128xf32, #tpu.memory_space<vmem>> -> memref<1x128xf32, #tpu.memory_space<vmem>>
    %131 = tpu.memref_slice %arg9[%c4_i32_84] : memref<16x!tpu.dma_semaphore, #tpu.memory_space<semaphore_mem>> -> memref<1x!tpu.dma_semaphore, #tpu.memory_space<semaphore_mem>>
    %132 = tpu.memref_squeeze %131 : memref<1x!tpu.dma_semaphore, #tpu.memory_space<semaphore_mem>> -> memref<!tpu.dma_semaphore, #tpu.memory_space<semaphore_mem>>
    tpu.wait_dma2 semaphore(%132 : memref<!tpu.dma_semaphore, #tpu.memory_space<semaphore_mem>>) src(%129 : memref<1x128xf32, #tpu.memory_space<any>>) dst(%130 : memref<1x128xf32, #tpu.memory_space<vmem>>)
    %c5_i32_89 = arith.constant 5 : i32
    %c0_i32_90 = arith.constant 0 : i32
    %c0_i32_91 = arith.constant 0 : i32
    %133 = tpu.memref_slice %arg6[%c0_i32_90, %c0_i32_91] : memref<64x128xf32, #tpu.memory_space<any>> -> memref<1x128xf32, #tpu.memory_space<any>>
    %c5_i32_92 = arith.constant 5 : i32
    %c0_i32_93 = arith.constant 0 : i32
    %134 = tpu.memref_slice %arg8[%c5_i32_92, %c0_i32_93] : memref<16x128xf32, #tpu.memory_space<vmem>> -> memref<1x128xf32, #tpu.memory_space<vmem>>
    %135 = tpu.memref_slice %arg9[%c5_i32_89] : memref<16x!tpu.dma_semaphore, #tpu.memory_space<semaphore_mem>> -> memref<1x!tpu.dma_semaphore, #tpu.memory_space<semaphore_mem>>
    %136 = tpu.memref_squeeze %135 : memref<1x!tpu.dma_semaphore, #tpu.memory_space<semaphore_mem>> -> memref<!tpu.dma_semaphore, #tpu.memory_space<semaphore_mem>>
    tpu.wait_dma2 semaphore(%136 : memref<!tpu.dma_semaphore, #tpu.memory_space<semaphore_mem>>) src(%133 : memref<1x128xf32, #tpu.memory_space<any>>) dst(%134 : memref<1x128xf32, #tpu.memory_space<vmem>>)
    %c6_i32_94 = arith.constant 6 : i32
    %c0_i32_95 = arith.constant 0 : i32
    %c0_i32_96 = arith.constant 0 : i32
    %137 = tpu.memref_slice %arg6[%c0_i32_95, %c0_i32_96] : memref<64x128xf32, #tpu.memory_space<any>> -> memref<1x128xf32, #tpu.memory_space<any>>
    %c6_i32_97 = arith.constant 6 : i32
    %c0_i32_98 = arith.constant 0 : i32
    %138 = tpu.memref_slice %arg8[%c6_i32_97, %c0_i32_98] : memref<16x128xf32, #tpu.memory_space<vmem>> -> memref<1x128xf32, #tpu.memory_space<vmem>>
    %139 = tpu.memref_slice %arg9[%c6_i32_94] : memref<16x!tpu.dma_semaphore, #tpu.memory_space<semaphore_mem>> -> memref<1x!tpu.dma_semaphore, #tpu.memory_space<semaphore_mem>>
    %140 = tpu.memref_squeeze %139 : memref<1x!tpu.dma_semaphore, #tpu.memory_space<semaphore_mem>> -> memref<!tpu.dma_semaphore, #tpu.memory_space<semaphore_mem>>
    tpu.wait_dma2 semaphore(%140 : memref<!tpu.dma_semaphore, #tpu.memory_space<semaphore_mem>>) src(%137 : memref<1x128xf32, #tpu.memory_space<any>>) dst(%138 : memref<1x128xf32, #tpu.memory_space<vmem>>)
    %c7_i32_99 = arith.constant 7 : i32
    %c0_i32_100 = arith.constant 0 : i32
    %c0_i32_101 = arith.constant 0 : i32
    %141 = tpu.memref_slice %arg6[%c0_i32_100, %c0_i32_101] : memref<64x128xf32, #tpu.memory_space<any>> -> memref<1x128xf32, #tpu.memory_space<any>>
    %c7_i32_102 = arith.constant 7 : i32
    %c0_i32_103 = arith.constant 0 : i32
    %142 = tpu.memref_slice %arg8[%c7_i32_102, %c0_i32_103] : memref<16x128xf32, #tpu.memory_space<vmem>> -> memref<1x128xf32, #tpu.memory_space<vmem>>
    %143 = tpu.memref_slice %arg9[%c7_i32_99] : memref<16x!tpu.dma_semaphore, #tpu.memory_space<semaphore_mem>> -> memref<1x!tpu.dma_semaphore, #tpu.memory_space<semaphore_mem>>
    %144 = tpu.memref_squeeze %143 : memref<1x!tpu.dma_semaphore, #tpu.memory_space<semaphore_mem>> -> memref<!tpu.dma_semaphore, #tpu.memory_space<semaphore_mem>>
    tpu.wait_dma2 semaphore(%144 : memref<!tpu.dma_semaphore, #tpu.memory_space<semaphore_mem>>) src(%141 : memref<1x128xf32, #tpu.memory_space<any>>) dst(%142 : memref<1x128xf32, #tpu.memory_space<vmem>>)
    %c8_i32_104 = arith.constant 8 : i32
    %c0_i32_105 = arith.constant 0 : i32
    %c0_i32_106 = arith.constant 0 : i32
    %145 = tpu.memref_slice %arg6[%c0_i32_105, %c0_i32_106] : memref<64x128xf32, #tpu.memory_space<any>> -> memref<1x128xf32, #tpu.memory_space<any>>
    %c8_i32_107 = arith.constant 8 : i32
    %c0_i32_108 = arith.constant 0 : i32
    %146 = tpu.memref_slice %arg8[%c8_i32_107, %c0_i32_108] : memref<16x128xf32, #tpu.memory_space<vmem>> -> memref<1x128xf32, #tpu.memory_space<vmem>>
    %147 = tpu.memref_slice %arg9[%c8_i32_104] : memref<16x!tpu.dma_semaphore, #tpu.memory_space<semaphore_mem>> -> memref<1x!tpu.dma_semaphore, #tpu.memory_space<semaphore_mem>>
    %148 = tpu.memref_squeeze %147 : memref<1x!tpu.dma_semaphore, #tpu.memory_space<semaphore_mem>> -> memref<!tpu.dma_semaphore, #tpu.memory_space<semaphore_mem>>
    tpu.wait_dma2 semaphore(%148 : memref<!tpu.dma_semaphore, #tpu.memory_space<semaphore_mem>>) src(%145 : memref<1x128xf32, #tpu.memory_space<any>>) dst(%146 : memref<1x128xf32, #tpu.memory_space<vmem>>)
    %c9_i32_109 = arith.constant 9 : i32
    %c0_i32_110 = arith.constant 0 : i32
    %c0_i32_111 = arith.constant 0 : i32
    %149 = tpu.memref_slice %arg6[%c0_i32_110, %c0_i32_111] : memref<64x128xf32, #tpu.memory_space<any>> -> memref<1x128xf32, #tpu.memory_space<any>>
    %c9_i32_112 = arith.constant 9 : i32
    %c0_i32_113 = arith.constant 0 : i32
    %150 = tpu.memref_slice %arg8[%c9_i32_112, %c0_i32_113] : memref<16x128xf32, #tpu.memory_space<vmem>> -> memref<1x128xf32, #tpu.memory_space<vmem>>
    %151 = tpu.memref_slice %arg9[%c9_i32_109] : memref<16x!tpu.dma_semaphore, #tpu.memory_space<semaphore_mem>> -> memref<1x!tpu.dma_semaphore, #tpu.memory_space<semaphore_mem>>
    %152 = tpu.memref_squeeze %151 : memref<1x!tpu.dma_semaphore, #tpu.memory_space<semaphore_mem>> -> memref<!tpu.dma_semaphore, #tpu.memory_space<semaphore_mem>>
    tpu.wait_dma2 semaphore(%152 : memref<!tpu.dma_semaphore, #tpu.memory_space<semaphore_mem>>) src(%149 : memref<1x128xf32, #tpu.memory_space<any>>) dst(%150 : memref<1x128xf32, #tpu.memory_space<vmem>>)
    %c10_i32_114 = arith.constant 10 : i32
    %c0_i32_115 = arith.constant 0 : i32
    %c0_i32_116 = arith.constant 0 : i32
    %153 = tpu.memref_slice %arg6[%c0_i32_115, %c0_i32_116] : memref<64x128xf32, #tpu.memory_space<any>> -> memref<1x128xf32, #tpu.memory_space<any>>
    %c10_i32_117 = arith.constant 10 : i32
    %c0_i32_118 = arith.constant 0 : i32
    %154 = tpu.memref_slice %arg8[%c10_i32_117, %c0_i32_118] : memref<16x128xf32, #tpu.memory_space<vmem>> -> memref<1x128xf32, #tpu.memory_space<vmem>>
    %155 = tpu.memref_slice %arg9[%c10_i32_114] : memref<16x!tpu.dma_semaphore, #tpu.memory_space<semaphore_mem>> -> memref<1x!tpu.dma_semaphore, #tpu.memory_space<semaphore_mem>>
    %156 = tpu.memref_squeeze %155 : memref<1x!tpu.dma_semaphore, #tpu.memory_space<semaphore_mem>> -> memref<!tpu.dma_semaphore, #tpu.memory_space<semaphore_mem>>
    tpu.wait_dma2 semaphore(%156 : memref<!tpu.dma_semaphore, #tpu.memory_space<semaphore_mem>>) src(%153 : memref<1x128xf32, #tpu.memory_space<any>>) dst(%154 : memref<1x128xf32, #tpu.memory_space<vmem>>)
    %c11_i32_119 = arith.constant 11 : i32
    %c0_i32_120 = arith.constant 0 : i32
    %c0_i32_121 = arith.constant 0 : i32
    %157 = tpu.memref_slice %arg6[%c0_i32_120, %c0_i32_121] : memref<64x128xf32, #tpu.memory_space<any>> -> memref<1x128xf32, #tpu.memory_space<any>>
    %c11_i32_122 = arith.constant 11 : i32
    %c0_i32_123 = arith.constant 0 : i32
    %158 = tpu.memref_slice %arg8[%c11_i32_122, %c0_i32_123] : memref<16x128xf32, #tpu.memory_space<vmem>> -> memref<1x128xf32, #tpu.memory_space<vmem>>
    %159 = tpu.memref_slice %arg9[%c11_i32_119] : memref<16x!tpu.dma_semaphore, #tpu.memory_space<semaphore_mem>> -> memref<1x!tpu.dma_semaphore, #tpu.memory_space<semaphore_mem>>
    %160 = tpu.memref_squeeze %159 : memref<1x!tpu.dma_semaphore, #tpu.memory_space<semaphore_mem>> -> memref<!tpu.dma_semaphore, #tpu.memory_space<semaphore_mem>>
    tpu.wait_dma2 semaphore(%160 : memref<!tpu.dma_semaphore, #tpu.memory_space<semaphore_mem>>) src(%157 : memref<1x128xf32, #tpu.memory_space<any>>) dst(%158 : memref<1x128xf32, #tpu.memory_space<vmem>>)
    %c12_i32_124 = arith.constant 12 : i32
    %c0_i32_125 = arith.constant 0 : i32
    %c0_i32_126 = arith.constant 0 : i32
    %161 = tpu.memref_slice %arg6[%c0_i32_125, %c0_i32_126] : memref<64x128xf32, #tpu.memory_space<any>> -> memref<1x128xf32, #tpu.memory_space<any>>
    %c12_i32_127 = arith.constant 12 : i32
    %c0_i32_128 = arith.constant 0 : i32
    %162 = tpu.memref_slice %arg8[%c12_i32_127, %c0_i32_128] : memref<16x128xf32, #tpu.memory_space<vmem>> -> memref<1x128xf32, #tpu.memory_space<vmem>>
    %163 = tpu.memref_slice %arg9[%c12_i32_124] : memref<16x!tpu.dma_semaphore, #tpu.memory_space<semaphore_mem>> -> memref<1x!tpu.dma_semaphore, #tpu.memory_space<semaphore_mem>>
    %164 = tpu.memref_squeeze %163 : memref<1x!tpu.dma_semaphore, #tpu.memory_space<semaphore_mem>> -> memref<!tpu.dma_semaphore, #tpu.memory_space<semaphore_mem>>
    tpu.wait_dma2 semaphore(%164 : memref<!tpu.dma_semaphore, #tpu.memory_space<semaphore_mem>>) src(%161 : memref<1x128xf32, #tpu.memory_space<any>>) dst(%162 : memref<1x128xf32, #tpu.memory_space<vmem>>)
    %c13_i32_129 = arith.constant 13 : i32
    %c0_i32_130 = arith.constant 0 : i32
    %c0_i32_131 = arith.constant 0 : i32
    %165 = tpu.memref_slice %arg6[%c0_i32_130, %c0_i32_131] : memref<64x128xf32, #tpu.memory_space<any>> -> memref<1x128xf32, #tpu.memory_space<any>>
    %c13_i32_132 = arith.constant 13 : i32
    %c0_i32_133 = arith.constant 0 : i32
    %166 = tpu.memref_slice %arg8[%c13_i32_132, %c0_i32_133] : memref<16x128xf32, #tpu.memory_space<vmem>> -> memref<1x128xf32, #tpu.memory_space<vmem>>
    %167 = tpu.memref_slice %arg9[%c13_i32_129] : memref<16x!tpu.dma_semaphore, #tpu.memory_space<semaphore_mem>> -> memref<1x!tpu.dma_semaphore, #tpu.memory_space<semaphore_mem>>
    %168 = tpu.memref_squeeze %167 : memref<1x!tpu.dma_semaphore, #tpu.memory_space<semaphore_mem>> -> memref<!tpu.dma_semaphore, #tpu.memory_space<semaphore_mem>>
    tpu.wait_dma2 semaphore(%168 : memref<!tpu.dma_semaphore, #tpu.memory_space<semaphore_mem>>) src(%165 : memref<1x128xf32, #tpu.memory_space<any>>) dst(%166 : memref<1x128xf32, #tpu.memory_space<vmem>>)
    %c14_i32_134 = arith.constant 14 : i32
    %c0_i32_135 = arith.constant 0 : i32
    %c0_i32_136 = arith.constant 0 : i32
    %169 = tpu.memref_slice %arg6[%c0_i32_135, %c0_i32_136] : memref<64x128xf32, #tpu.memory_space<any>> -> memref<1x128xf32, #tpu.memory_space<any>>
    %c14_i32_137 = arith.constant 14 : i32
    %c0_i32_138 = arith.constant 0 : i32
    %170 = tpu.memref_slice %arg8[%c14_i32_137, %c0_i32_138] : memref<16x128xf32, #tpu.memory_space<vmem>> -> memref<1x128xf32, #tpu.memory_space<vmem>>
    %171 = tpu.memref_slice %arg9[%c14_i32_134] : memref<16x!tpu.dma_semaphore, #tpu.memory_space<semaphore_mem>> -> memref<1x!tpu.dma_semaphore, #tpu.memory_space<semaphore_mem>>
    %172 = tpu.memref_squeeze %171 : memref<1x!tpu.dma_semaphore, #tpu.memory_space<semaphore_mem>> -> memref<!tpu.dma_semaphore, #tpu.memory_space<semaphore_mem>>
    tpu.wait_dma2 semaphore(%172 : memref<!tpu.dma_semaphore, #tpu.memory_space<semaphore_mem>>) src(%169 : memref<1x128xf32, #tpu.memory_space<any>>) dst(%170 : memref<1x128xf32, #tpu.memory_space<vmem>>)
    %c15_i32_139 = arith.constant 15 : i32
    %c0_i32_140 = arith.constant 0 : i32
    %c0_i32_141 = arith.constant 0 : i32
    %173 = tpu.memref_slice %arg6[%c0_i32_140, %c0_i32_141] : memref<64x128xf32, #tpu.memory_space<any>> -> memref<1x128xf32, #tpu.memory_space<any>>
    %c15_i32_142 = arith.constant 15 : i32
    %c0_i32_143 = arith.constant 0 : i32
    %174 = tpu.memref_slice %arg8[%c15_i32_142, %c0_i32_143] : memref<16x128xf32, #tpu.memory_space<vmem>> -> memref<1x128xf32, #tpu.memory_space<vmem>>
    %175 = tpu.memref_slice %arg9[%c15_i32_139] : memref<16x!tpu.dma_semaphore, #tpu.memory_space<semaphore_mem>> -> memref<1x!tpu.dma_semaphore, #tpu.memory_space<semaphore_mem>>
    %176 = tpu.memref_squeeze %175 : memref<1x!tpu.dma_semaphore, #tpu.memory_space<semaphore_mem>> -> memref<!tpu.dma_semaphore, #tpu.memory_space<semaphore_mem>>
    tpu.wait_dma2 semaphore(%176 : memref<!tpu.dma_semaphore, #tpu.memory_space<semaphore_mem>>) src(%173 : memref<1x128xf32, #tpu.memory_space<any>>) dst(%174 : memref<1x128xf32, #tpu.memory_space<vmem>>)
    %c0 = arith.constant 0 : index
    %c0_144 = arith.constant 0 : index
    %177 = vector.load %arg8[%c0, %c0_144] : memref<16x128xf32, #tpu.memory_space<vmem>>, vector<16x128xf32>
    %c0_145 = arith.constant 0 : index
    %c0_146 = arith.constant 0 : index
    %178 = vector.load %arg2[%c0_145, %c0_146] : memref<16x1xi32, #tpu.memory_space<vmem>>, vector<16x1xi32>
    %c0_i32_147 = arith.constant 0 : i32
    %179 = vector.broadcast %c0_i32_147 : i32 to vector<16x1xi32>
    %180 = arith.cmpi eq, %178, %179 : vector<16x1xi32>
    %c0_148 = arith.constant 0 : index
    %c0_149 = arith.constant 0 : index
    %181 = vector.load %arg4[%c0_148, %c0_149] : memref<2x128xf32, #tpu.memory_space<vmem>>, vector<1x128xf32>
    %c1 = arith.constant 1 : index
    %c0_150 = arith.constant 0 : index
    %182 = vector.load %arg4[%c1, %c0_150] : memref<2x128xf32, #tpu.memory_space<vmem>>, vector<1x128xf32>
    %183 = vector.shape_cast %180 : vector<16x1xi1> to vector<16x1xi1>
    %184 = vector.broadcast %183 : vector<16x1xi1> to vector<16x128xi1>
    %185 = vector.shape_cast %181 : vector<1x128xf32> to vector<1x128xf32>
    %186 = vector.broadcast %185 : vector<1x128xf32> to vector<16x128xf32>
    %187 = vector.shape_cast %182 : vector<1x128xf32> to vector<1x128xf32>
    %188 = vector.broadcast %187 : vector<1x128xf32> to vector<16x128xf32>
    %189 = arith.select %184, %186, %188 : vector<16x128xi1>, vector<16x128xf32>
    %c0_151 = arith.constant 0 : index
    %c0_152 = arith.constant 0 : index
    %190 = vector.load %arg3[%c0_151, %c0_152] : memref<8x128xf32, #tpu.memory_space<vmem>>, vector<8x128xf32>
    %191 = tpu.concatenate %190, %190 in 0 : vector<8x128xf32>, vector<8x128xf32> -> vector<16x128xf32>
    %192 = arith.addf %177, %189 : vector<16x128xf32>
    %193 = arith.addf %192, %191 : vector<16x128xf32>
    %cst = arith.constant dense<0.000000e+00> : vector<16xf32>
    %194 = vector.multi_reduction <add>, %193, %cst [1] : vector<16x128xf32> to vector<16xf32>
    %195 = vector.shape_cast %194 : vector<16xf32> to vector<16x1xf32>
    %196 = arith.mulf %193, %193 : vector<16x128xf32>
    %cst_153 = arith.constant dense<0.000000e+00> : vector<16xf32>
    %197 = vector.multi_reduction <add>, %196, %cst_153 [1] : vector<16x128xf32> to vector<16xf32>
    %198 = vector.shape_cast %197 : vector<16xf32> to vector<16x1xf32>
    %cst_154 = arith.constant 7.812500e-03 : f32
    %199 = vector.broadcast %cst_154 : f32 to vector<16x1xf32>
    %200 = arith.mulf %195, %199 : vector<16x1xf32>
    %cst_155 = arith.constant 7.812500e-03 : f32
    %201 = vector.broadcast %cst_155 : f32 to vector<16x1xf32>
    %202 = arith.mulf %198, %201 : vector<16x1xf32>
    %203 = arith.mulf %200, %200 : vector<16x1xf32>
    %204 = arith.subf %202, %203 : vector<16x1xf32>
    %205 = vector.broadcast %200 : vector<16x1xf32> to vector<16x128xf32>
    %206 = arith.subf %193, %205 : vector<16x128xf32>
    %cst_156 = arith.constant 9.99999996E-13 : f32
    %207 = vector.broadcast %cst_156 : f32 to vector<16x1xf32>
    %208 = arith.addf %204, %207 : vector<16x1xf32>
    %209 = math.rsqrt %208 : vector<16x1xf32>
    %210 = vector.broadcast %209 : vector<16x1xf32> to vector<16x128xf32>
    %211 = arith.mulf %206, %210 : vector<16x128xf32>
    %c0_157 = arith.constant 0 : index
    %c0_158 = arith.constant 0 : index
    %212 = vector.load %arg5[%c0_157, %c0_158] : memref<2x128xf32, #tpu.memory_space<vmem>>, vector<1x128xf32>
    %213 = vector.broadcast %212 : vector<1x128xf32> to vector<16x128xf32>
    %214 = arith.mulf %211, %213 : vector<16x128xf32>
    %c1_159 = arith.constant 1 : index
    %c0_160 = arith.constant 0 : index
    %215 = vector.load %arg5[%c1_159, %c0_160] : memref<2x128xf32, #tpu.memory_space<vmem>>, vector<1x128xf32>
    %216 = vector.broadcast %215 : vector<1x128xf32> to vector<16x128xf32>
    %217 = arith.addf %214, %216 : vector<16x128xf32>
    %c0_161 = arith.constant 0 : index
    %c0_162 = arith.constant 0 : index
    %218 = vector.load %arg7[%c0_161, %c0_162] : memref<16x128xf32, #tpu.memory_space<vmem>>, vector<16x128xf32>
    tpu.vector_store %arg7[%c0_161, %c0_162], %217 {strides = array<i32>} : memref<16x128xf32, #tpu.memory_space<vmem>>, vector<16x128xf32>,
    return
  }
  func.func @transform_0(%arg0: i32, %arg1: memref<16xi32, #tpu.memory_space<smem>>) -> (i32, i32) {
    %c0_i32 = arith.constant 0 : i32
    %c0_i32_0 = arith.constant 0 : i32
    return %arg0, %c0_i32 : i32, i32
  }
  func.func @transform_1(%arg0: i32, %arg1: memref<16xi32, #tpu.memory_space<smem>>) -> (i32, i32) {
    %c0_i32 = arith.constant 0 : i32
    %c0_i32_0 = arith.constant 0 : i32
    %c0_i32_1 = arith.constant 0 : i32
    return %c0_i32, %c0_i32_0 : i32, i32
  }
  func.func @transform_2(%arg0: i32, %arg1: memref<16xi32, #tpu.memory_space<smem>>) -> (i32, i32) {
    %c0_i32 = arith.constant 0 : i32
    %c0_i32_0 = arith.constant 0 : i32
    %c0_i32_1 = arith.constant 0 : i32
    return %c0_i32, %c0_i32_0 : i32, i32
  }
  func.func @transform_3(%arg0: i32, %arg1: memref<16xi32, #tpu.memory_space<smem>>) -> (i32, i32) {
    %c0_i32 = arith.constant 0 : i32
    %c0_i32_0 = arith.constant 0 : i32
    %c0_i32_1 = arith.constant 0 : i32
    return %c0_i32, %c0_i32_0 : i32, i32
  }
  func.func @transform_5(%arg0: i32, %arg1: memref<16xi32, #tpu.memory_space<smem>>) -> (i32, i32) {
    %c0_i32 = arith.constant 0 : i32
    %c0_i32_0 = arith.constant 0 : i32
    return %arg0, %c0_i32 : i32, i32
  }
}

</mosaic_0001>

<bundles_post_ra>
// kernel: tpu_custom_call.1
= control target key start
LH: loop header
LB: loop body
LE: loop exit
PB: predicated region body
PF: predicated region fallthrough
CT: control target
= control target key end

     0   :  { %s1449_s0 = inlined_call_operand.vmem [shape: s32[16], index: 0, kind: input, shape index: {}]   ;;  %s1450_s1 = inlined_call_operand.vmem [shape: s32[16,1], index: 1, kind: input, shape index: {}]   ;;  %s1451_s2 = inlined_call_operand.vmem [shape: f32[8,128], index: 2, kind: input, shape index: {}]   ;;  %s1452_s3 = inlined_call_operand.vmem [shape: f32[2,128], index: 3, kind: input, shape index: {}]   ;;  %s1453_s4 = inlined_call_operand.vmem [shape: f32[2,128], index: 4, kind: input, shape index: {}]   ;;  %s1454_s5 = inlined_call_operand.hbm [shape: f32[64,128], index: 5, kind: input, shape index: {}]   ;;  %s1455_s6 = inlined_call_operand.hbm [shape: f32[16,128], index: 6, kind: output, shape index: {}]  }
   0x1   :  { %s11_s23 = sshll.u32 %s1449_s0, 4  ;;  %s12_s23 = int_to_ptr.vmem [resolvable:$true] %s11_s23 }
   0x2   :  { %s640_s24 = scalar_lea.vmem %s12_s23, 16  ;;  %p645_p1 = scmp.lt.s32.totalorder %s12_s23, %s12_s23 }
   0x3   :  { %p641_p0 = scmp.ne.s32.totalorder %s12_s23, %s640_s24  ;;  %p646_p2 = scmp.lt.s32.totalorder %s640_s24, %s640_s24 }
   0x5   :  { %p647_p3 = por %p646_p2, %p645_p1 }
   0x7   :  { %p648_p4 = pnand %p647_p3, %p641_p0 }
   0x9   :  { %651 = shalt.err (!%p648_p4)  }
   0xa   :  { %s1094_s25 = smov [#allocation5]  }
   0xb   :  { %14 = dma.vmem_to_smem %s12_s23, 16, %s1094_s25, [#allocation4] }
   0xc   :  { %1058 = dma.done.wait [#allocation4], 16 }
   0xd   :  { %1059 = vsyncadd [#allocation4], 4294967280 }
   0xe   :  { %16 = sfence }
   0xf   :  { %17 = vsyncpa [#allocation7], 0  ;;  %s27_s26 = sld [smem:[#allocation5]]  ;;  %s1095_s27 = smov [#allocation2]  }
  0x10   :  { %s37_s28 = sshll.u32 %s1095_s27, 4  ;;  %s1153_s29 = sld [smem:[#allocation5 + $0x1]]  ;;  %s1155_s28 = int_to_ptr.vmem [resolvable:$true] %s37_s28 }
  0x11   :  { %s1096_s0 = smov [#allocation2 + $0x1]   ;;  %s1157_s7 = sld [smem:[#allocation5 + $0x2]] }
  0x12   :  { %s54_s30 = sshll.u32 %s1096_s0, 4  ;;  %s1097_s8 = smov [#allocation2 + $0x2]   ;;  %s1159_s30 = int_to_ptr.vmem [resolvable:$true] %s54_s30 }
  0x13   :  { %s71_s9 = sshll.u32 %s1097_s8, 4  ;;  %s1161_s10 = sld [smem:[#allocation5 + $0x3]]  ;;  %s1163_s9 = int_to_ptr.vmem [resolvable:$true] %s71_s9 }
  0x14   :  { %s1172_s19 = scalar_lea.hbm %s1454_s5, 1024 }
  0x15   :  { %s563_s11 = sshll.u32 %s27_s26, 4 }
  0x16   :  { %s29_s14 = scalar_lea.hbm %s1454_s5, %s563_s11  ;;  %s565_s15 = sshll.u32 %s1153_s29, 4 }
  0x17   :  { %s652_s16 = scalar_lea.hbm %s29_s14, 16  ;;  %p655_p6 = scmp.lt.u32.totalorder %s29_s14, %s1454_s5 }
  0x18   :  { %p653_p5 = scmp.ne.s32.totalorder %s29_s14, %s652_s16  ;;  %p656_p7 = scmp.lt.u32.totalorder %s1172_s19, %s652_s16 }
  0x19   :  { %p658_p9 = scmp.lt.u32.totalorder %s652_s16, %s29_s14 }
  0x1a   :  { %p657_p8 = por %p656_p7, %p655_p6 }
  0x1c   :  { %p659_p10 = por %p658_p9, %p657_p8 }
  0x1e   :  { %p660_p11 = pnand %p659_p10, %p653_p5 }
  0x20   :  { %663 = shalt.err (!%p660_p11)  }
  0x21   :  { %s664_s22 = scalar_lea.vmem %s1155_s28, 16  ;;  %s1181_s23 = scalar_lea.vmem %s1155_s28, 256 }
  0x22   :  { %p665_p12 = scmp.ne.s32.totalorder %s1155_s28, %s664_s22  ;;  %p669_p13 = scmp.lt.s32.totalorder %s1155_s28, %s1155_s28 }
  0x23   :  { %p670_p0 = scmp.lt.s32.totalorder %s1181_s23, %s664_s22 }
  0x25   :  { %p671_p1 = por %p670_p0, %p669_p13 }
  0x27   :  { %p672_p2 = pnand %p671_p1, %p665_p12 }
  0x29   :  { %675 = shalt.err (!%p672_p2)  }
  0x2a   :  { %40 = dma.hbm_to_vmem [thread:$0]  %s29_s14, 16, %s1155_s28, [#allocation3] }
  0x2b   :  { %s44_s26 = scalar_lea.hbm %s1454_s5, %s565_s15  ;;  %s567_s27 = sshll.u32 %s1157_s7, 4 }
  0x2c   :  { %s676_s29 = scalar_lea.hbm %s44_s26, 16  ;;  %p679_p4 = scmp.lt.u32.totalorder %s44_s26, %s1454_s5 }
  0x2d   :  { %p677_p3 = scmp.ne.s32.totalorder %s44_s26, %s676_s29  ;;  %p680_p5 = scmp.lt.u32.totalorder %s1172_s19, %s676_s29 }
  0x2e   :  { %p682_p7 = scmp.lt.u32.totalorder %s676_s29, %s44_s26 }
  0x2f   :  { %p681_p6 = por %p680_p5, %p679_p4 }
  0x31   :  { %p683_p8 = por %p682_p7, %p681_p6 }
  0x33   :  { %p684_p9 = pnand %p683_p8, %p677_p3 }
  0x35   :  { %687 = shalt.err (!%p684_p9)  }
  0x36   :  { %s688_s11 = scalar_lea.vmem %s1159_s30, 16  ;;  %p693_p11 = scmp.lt.s32.totalorder %s1159_s30, %s1155_s28 }
  0x37   :  { %p689_p10 = scmp.ne.s32.totalorder %s1159_s30, %s688_s11  ;;  %p694_p12 = scmp.lt.s32.totalorder %s1181_s23, %s688_s11 }
  0x39   :  { %p695_p13 = por %p694_p12, %p693_p11 }
  0x3b   :  { %p696_p0 = pnand %p695_p13, %p689_p10 }
  0x3d   :  { %699 = shalt.err (!%p696_p0)  }
  0x3e   :  { %57 = dma.hbm_to_vmem [thread:$0]  %s44_s26, 16, %s1159_s30, [#allocation3 + $0x1] }
  0x3f   :  { %s61_s13 = scalar_lea.hbm %s1454_s5, %s567_s27  ;;  %s569_s14 = sshll.u32 %s1161_s10, 4 }
  0x40   :  { %s700_s15 = scalar_lea.hbm %s61_s13, 16  ;;  %p703_p2 = scmp.lt.u32.totalorder %s61_s13, %s1454_s5 }
  0x41   :  { %p701_p1 = scmp.ne.s32.totalorder %s61_s13, %s700_s15  ;;  %p704_p3 = scmp.lt.u32.totalorder %s1172_s19, %s700_s15 }
  0x42   :  { %p706_p5 = scmp.lt.u32.totalorder %s700_s15, %s61_s13 }
  0x43   :  { %p705_p4 = por %p704_p3, %p703_p2 }
  0x45   :  { %p707_p6 = por %p706_p5, %p705_p4 }
  0x47   :  { %p708_p7 = pnand %p707_p6, %p701_p1 }
  0x49   :  { %711 = shalt.err (!%p708_p7)  }
  0x4a   :  { %s712_s30 = scalar_lea.vmem %s1163_s9, 16  ;;  %p717_p9 = scmp.lt.s32.totalorder %s1163_s9, %s1155_s28 }
  0x4b   :  { %p713_p8 = scmp.ne.s32.totalorder %s1163_s9, %s712_s30  ;;  %p718_p10 = scmp.lt.s32.totalorder %s1181_s23, %s712_s30 }
  0x4d   :  { %p719_p11 = por %p718_p10, %p717_p9 }
  0x4f   :  { %p720_p12 = pnand %p719_p11, %p713_p8 }
  0x51   :  { %723 = shalt.err (!%p720_p12)  }
  0x52   :  { %74 = dma.hbm_to_vmem [thread:$0]  %s61_s13, 16, %s1163_s9, [#allocation3 + $0x2] }
  0x53   :  { %s78_s20 = scalar_lea.hbm %s1454_s5, %s569_s14  ;;  %s1098_s21 = smov [#allocation2 + $0x3]  }
  0x54   :  { %s88_s22 = sshll.u32 %s1098_s21, 4  ;;  %s1218_s24 = sld [smem:[#allocation5 + $0x4]]  ;;  %s89_s22 = int_to_ptr.vmem [resolvable:$true] %s88_s22 }
  0x55   :  { %s724_s25 = scalar_lea.hbm %s78_s20, 16  ;;  %p727_p0 = scmp.lt.u32.totalorder %s78_s20, %s1454_s5 }
  0x56   :  { %p725_p13 = scmp.ne.s32.totalorder %s78_s20, %s724_s25  ;;  %p728_p1 = scmp.lt.u32.totalorder %s1172_s19, %s724_s25 }
  0x57   :  { %p730_p3 = scmp.lt.u32.totalorder %s724_s25, %s78_s20 }
  0x58   :  { %p729_p2 = por %p728_p1, %p727_p0 }
  0x5a   :  { %p731_p4 = por %p730_p3, %p729_p2 }
  0x5c   :  { %p732_p5 = pnand %p731_p4, %p725_p13 }
  0x5e   :  { %735 = shalt.err (!%p732_p5)  }
  0x5f   :  { %s736_s9 = scalar_lea.vmem %s89_s22, 16  ;;  %p741_p7 = scmp.lt.s32.totalorder %s89_s22, %s1155_s28 }
  0x60   :  { %p737_p6 = scmp.ne.s32.totalorder %s89_s22, %s736_s9  ;;  %p742_p8 = scmp.lt.s32.totalorder %s1181_s23, %s736_s9 }
  0x62   :  { %p743_p9 = por %p742_p8, %p741_p7 }
  0x64   :  { %p744_p10 = pnand %p743_p9, %p737_p6 }
  0x66   :  { %747 = shalt.err (!%p744_p10)  }
  0x67   :  { %91 = dma.hbm_to_vmem [thread:$0]  %s78_s20, 16, %s89_s22, [#allocation3 + $0x3] }
  0x68   :  { %s1099_s29 = smov [#allocation2 + $0x4]   ;;  %s1226_s8 = sld [smem:[#allocation5 + $0x5]] }
  0x69   :  { %s105_s0 = sshll.u32 %s1099_s29, 4  ;;  %s1100_s11 = smov [#allocation2 + $0x5]   ;;  %s106_s0 = int_to_ptr.vmem [resolvable:$true] %s105_s0 }
  0x6a   :  { %s122_s7 = sshll.u32 %s1100_s11, 4  ;;  %s1228_s12 = sld [smem:[#allocation5 + $0x6]]  ;;  %s1231_s7 = int_to_ptr.vmem [resolvable:$true] %s122_s7 }
  0x6b   :  { %s571_s13 = sshll.u32 %s1218_s24, 4 }
  0x6c   :  { %s95_s16 = scalar_lea.hbm %s1454_s5, %s571_s13 }
  0x6d   :  { %s748_s17 = scalar_lea.hbm %s95_s16, 16  ;;  %p751_p12 = scmp.lt.u32.totalorder %s95_s16, %s1454_s5 }
  0x6e   :  { %p749_p11 = scmp.ne.s32.totalorder %s95_s16, %s748_s17  ;;  %p752_p13 = scmp.lt.u32.totalorder %s1172_s19, %s748_s17 }
  0x6f   :  { %p754_p1 = scmp.lt.u32.totalorder %s748_s17, %s95_s16 }
  0x70   :  { %p753_p0 = por %p752_p13, %p751_p12 }
  0x72   :  { %p755_p2 = por %p754_p1, %p753_p0 }
  0x74   :  { %p756_p3 = pnand %p755_p2, %p749_p11 }
  0x76   :  { %759 = shalt.err (!%p756_p3)  }
  0x77   :  { %s760_s18 = scalar_lea.vmem %s106_s0, 16  ;;  %p765_p5 = scmp.lt.s32.totalorder %s106_s0, %s1155_s28 }
  0x78   :  { %p761_p4 = scmp.ne.s32.totalorder %s106_s0, %s760_s18  ;;  %p766_p6 = scmp.lt.s32.totalorder %s1181_s23, %s760_s18 }
  0x7a   :  { %p767_p7 = por %p766_p6, %p765_p5 }
  0x7c   :  { %p768_p8 = pnand %p767_p7, %p761_p4 }
  0x7e   :  { %771 = shalt.err (!%p768_p8)  }
  0x7f   :  { %108 = dma.hbm_to_vmem [thread:$0]  %s95_s16, 16, %s106_s0, [#allocation3 + $0x4] }
  0x80   :  { %s573_s20 = sshll.u32 %s1226_s8, 4  ;;  %s1101_s21 = smov [#allocation2 + $0x6]  }
  0x81   :  { %s139_s22 = sshll.u32 %s1101_s21, 4  ;;  %s112_s26 = scalar_lea.hbm %s1454_s5, %s573_s20  ;;  %s1246_s22 = int_to_ptr.vmem [resolvable:$true] %s139_s22 }
  0x82   :  { %s772_s27 = scalar_lea.hbm %s112_s26, 16  ;;  %p775_p10 = scmp.lt.u32.totalorder %s112_s26, %s1454_s5 }
  0x83   :  { %p773_p9 = scmp.ne.s32.totalorder %s112_s26, %s772_s27  ;;  %p776_p11 = scmp.lt.u32.totalorder %s1172_s19, %s772_s27 }
  0x84   :  { %p778_p13 = scmp.lt.u32.totalorder %s772_s27, %s112_s26 }
  0x85   :  { %p777_p12 = por %p776_p11, %p775_p10 }
  0x87   :  { %p779_p0 = por %p778_p13, %p777_p12 }
  0x89   :  { %p780_p1 = pnand %p779_p0, %p773_p9 }
  0x8b   :  { %783 = shalt.err (!%p780_p1)  }
  0x8c   :  { %s784_s0 = scalar_lea.vmem %s1231_s7, 16  ;;  %p789_p3 = scmp.lt.s32.totalorder %s1231_s7, %s1155_s28 }
  0x8d   :  { %p785_p2 = scmp.ne.s32.totalorder %s1231_s7, %s784_s0  ;;  %p790_p4 = scmp.lt.s32.totalorder %s1181_s23, %s784_s0 }
  0x8f   :  { %p791_p5 = por %p790_p4, %p789_p3 }
  0x91   :  { %p792_p6 = pnand %p791_p5, %p785_p2 }
  0x93   :  { %795 = shalt.err (!%p792_p6)  }
  0x94   :  { %125 = dma.hbm_to_vmem [thread:$0]  %s112_s26, 16, %s1231_s7, [#allocation3 + $0x5] }
  0x95   :  { %s575_s8 = sshll.u32 %s1228_s12, 4  ;;  %s1259_s11 = sld [smem:[#allocation5 + $0x7]] }
  0x96   :  { %s129_s15 = scalar_lea.hbm %s1454_s5, %s575_s8 }
  0x97   :  { %s796_s16 = scalar_lea.hbm %s129_s15, 16  ;;  %p799_p8 = scmp.lt.u32.totalorder %s129_s15, %s1454_s5 }
  0x98   :  { %p797_p7 = scmp.ne.s32.totalorder %s129_s15, %s796_s16  ;;  %p800_p9 = scmp.lt.u32.totalorder %s1172_s19, %s796_s16 }
  0x99   :  { %p802_p11 = scmp.lt.u32.totalorder %s796_s16, %s129_s15 }
  0x9a   :  { %p801_p10 = por %p800_p9, %p799_p8 }
  0x9c   :  { %p803_p12 = por %p802_p11, %p801_p10 }
  0x9e   :  { %p804_p13 = pnand %p803_p12, %p797_p7 }
  0xa0   :  { %807 = shalt.err (!%p804_p13)  }
  0xa1   :  { %s808_s7 = scalar_lea.vmem %s1246_s22, 16  ;;  %p813_p1 = scmp.lt.s32.totalorder %s1246_s22, %s1155_s28 }
  0xa2   :  { %p809_p0 = scmp.ne.s32.totalorder %s1246_s22, %s808_s7  ;;  %p814_p2 = scmp.lt.s32.totalorder %s1181_s23, %s808_s7 }
  0xa4   :  { %p815_p3 = por %p814_p2, %p813_p1 }
  0xa6   :  { %p816_p4 = pnand %p815_p3, %p809_p0 }
  0xa8   :  { %819 = shalt.err (!%p816_p4)  }
  0xa9   :  { %142 = dma.hbm_to_vmem [thread:$0]  %s129_s15, 16, %s1246_s22, [#allocation3 + $0x6] }
  0xaa   :  { %s1102_s12 = smov [#allocation2 + $0x7]   ;;  %s1274_s18 = sld [smem:[#allocation5 + $0x8]] }
  0xab   :  { %s156_s10 = sshll.u32 %s1102_s12, 4  ;;  %s1103_s20 = smov [#allocation2 + $0x8]   ;;  %s157_s10 = int_to_ptr.vmem [resolvable:$true] %s156_s10 }
  0xac   :  { %s173_s21 = sshll.u32 %s1103_s20, 4  ;;  %s1276_s24 = sld [smem:[#allocation5 + $0x9]]  ;;  %s1279_s21 = int_to_ptr.vmem [resolvable:$true] %s173_s21 }
  0xad   :  { %s577_s25 = sshll.u32 %s1259_s11, 4 }
  0xae   :  { %s146_s9 = scalar_lea.hbm %s1454_s5, %s577_s25 }
  0xaf   :  { %s820_s29 = scalar_lea.hbm %s146_s9, 16  ;;  %p823_p6 = scmp.lt.u32.totalorder %s146_s9, %s1454_s5 }
  0xb0   :  { %p821_p5 = scmp.ne.s32.totalorder %s146_s9, %s820_s29  ;;  %p824_p7 = scmp.lt.u32.totalorder %s1172_s19, %s820_s29 }
  0xb1   :  { %p826_p9 = scmp.lt.u32.totalorder %s820_s29, %s146_s9 }
  0xb2   :  { %p825_p8 = por %p824_p7, %p823_p6 }
  0xb4   :  { %p827_p10 = por %p826_p9, %p825_p8 }
  0xb6   :  { %p828_p11 = pnand %p827_p10, %p821_p5 }
  0xb8   :  { %831 = shalt.err (!%p828_p11)  }
  0xb9   :  { %s832_s8 = scalar_lea.vmem %s157_s10, 16  ;;  %p837_p13 = scmp.lt.s32.totalorder %s157_s10, %s1155_s28 }
  0xba   :  { %p833_p12 = scmp.ne.s32.totalorder %s157_s10, %s832_s8  ;;  %p838_p0 = scmp.lt.s32.totalorder %s1181_s23, %s832_s8 }
  0xbc   :  { %p839_p1 = por %p838_p0, %p837_p13 }
  0xbe   :  { %p840_p2 = pnand %p839_p1, %p833_p12 }
  0xc0   :  { %843 = shalt.err (!%p840_p2)  }
  0xc1   :  { %159 = dma.hbm_to_vmem [thread:$0]  %s146_s9, 16, %s157_s10, [#allocation3 + $0x7] }
  0xc2   :  { %s579_s11 = sshll.u32 %s1274_s18, 4  ;;  %s1104_s13 = smov [#allocation2 + $0x9]  }
  0xc3   :  { %s190_s14 = sshll.u32 %s1104_s13, 4  ;;  %s163_s17 = scalar_lea.hbm %s1454_s5, %s579_s11  ;;  %s1294_s14 = int_to_ptr.vmem [resolvable:$true] %s190_s14 }
  0xc4   :  { %s844_s30 = scalar_lea.hbm %s163_s17, 16  ;;  %p847_p4 = scmp.lt.u32.totalorder %s163_s17, %s1454_s5 }
  0xc5   :  { %p845_p3 = scmp.ne.s32.totalorder %s163_s17, %s844_s30  ;;  %p848_p5 = scmp.lt.u32.totalorder %s1172_s19, %s844_s30 }
  0xc6   :  { %p850_p7 = scmp.lt.u32.totalorder %s844_s30, %s163_s17 }
  0xc7   :  { %p849_p6 = por %p848_p5, %p847_p4 }
  0xc9   :  { %p851_p8 = por %p850_p7, %p849_p6 }
  0xcb   :  { %p852_p9 = pnand %p851_p8, %p845_p3 }
  0xcd   :  { %855 = shalt.err (!%p852_p9)  }
  0xce   :  { %s856_s10 = scalar_lea.vmem %s1279_s21, 16  ;;  %p861_p11 = scmp.lt.s32.totalorder %s1279_s21, %s1155_s28 }
  0xcf   :  { %p857_p10 = scmp.ne.s32.totalorder %s1279_s21, %s856_s10  ;;  %p862_p12 = scmp.lt.s32.totalorder %s1181_s23, %s856_s10 }
  0xd1   :  { %p863_p13 = por %p862_p12, %p861_p11 }
  0xd3   :  { %p864_p0 = pnand %p863_p13, %p857_p10 }
  0xd5   :  { %867 = shalt.err (!%p864_p0)  }
  0xd6   :  { %176 = dma.hbm_to_vmem [thread:$0]  %s163_s17, 16, %s1279_s21, [#allocation3 + $0x8] }
  0xd7   :  { %s581_s18 = sshll.u32 %s1276_s24, 4  ;;  %s1307_s20 = sld [smem:[#allocation5 + $0xa]] }
  0xd8   :  { %s180_s27 = scalar_lea.hbm %s1454_s5, %s581_s18 }
  0xd9   :  { %s868_s9 = scalar_lea.hbm %s180_s27, 16  ;;  %p871_p2 = scmp.lt.u32.totalorder %s180_s27, %s1454_s5 }
  0xda   :  { %p869_p1 = scmp.ne.s32.totalorder %s180_s27, %s868_s9  ;;  %p872_p3 = scmp.lt.u32.totalorder %s1172_s19, %s868_s9 }
  0xdb   :  { %p874_p5 = scmp.lt.u32.totalorder %s868_s9, %s180_s27 }
  0xdc   :  { %p873_p4 = por %p872_p3, %p871_p2 }
  0xde   :  { %p875_p6 = por %p874_p5, %p873_p4 }
  0xe0   :  { %p876_p7 = pnand %p875_p6, %p869_p1 }
  0xe2   :  { %879 = shalt.err (!%p876_p7)  }
  0xe3   :  { %s880_s21 = scalar_lea.vmem %s1294_s14, 16  ;;  %p885_p9 = scmp.lt.s32.totalorder %s1294_s14, %s1155_s28 }
  0xe4   :  { %p881_p8 = scmp.ne.s32.totalorder %s1294_s14, %s880_s21  ;;  %p886_p10 = scmp.lt.s32.totalorder %s1181_s23, %s880_s21 }
  0xe6   :  { %p887_p11 = por %p886_p10, %p885_p9 }
  0xe8   :  { %p888_p12 = pnand %p887_p11, %p881_p8 }
  0xea   :  { %891 = shalt.err (!%p888_p12)  }
  0xeb   :  { %193 = dma.hbm_to_vmem [thread:$0]  %s180_s27, 16, %s1294_s14, [#allocation3 + $0x9] }
  0xec   :  { %s1105_s24 = smov [#allocation2 + $0xa]   ;;  %s1322_s8 = sld [smem:[#allocation5 + $0xb]] }
  0xed   :  { %s207_s22 = sshll.u32 %s1105_s24, 4  ;;  %s1106_s11 = smov [#allocation2 + $0xb]   ;;  %s208_s22 = int_to_ptr.vmem [resolvable:$true] %s207_s22 }
  0xee   :  { %s224_s13 = sshll.u32 %s1106_s11, 4  ;;  %s1324_s15 = sld [smem:[#allocation5 + $0xc]]  ;;  %s1327_s13 = int_to_ptr.vmem [resolvable:$true] %s224_s13 }
  0xef   :  { %s583_s16 = sshll.u32 %s1307_s20, 4 }
  0xf0   :  { %s197_s7 = scalar_lea.hbm %s1454_s5, %s583_s16 }
  0xf1   :  { %s892_s12 = scalar_lea.hbm %s197_s7, 16  ;;  %p895_p0 = scmp.lt.u32.totalorder %s197_s7, %s1454_s5 }
  0xf2   :  { %p893_p13 = scmp.ne.s32.totalorder %s197_s7, %s892_s12  ;;  %p896_p1 = scmp.lt.u32.totalorder %s1172_s19, %s892_s12 }
  0xf3   :  { %p898_p3 = scmp.lt.u32.totalorder %s892_s12, %s197_s7 }
  0xf4   :  { %p897_p2 = por %p896_p1, %p895_p0 }
  0xf6   :  { %p899_p4 = por %p898_p3, %p897_p2 }
  0xf8   :  { %p900_p5 = pnand %p899_p4, %p893_p13 }
  0xfa   :  { %903 = shalt.err (!%p900_p5)  }
  0xfb   :  { %s904_s18 = scalar_lea.vmem %s208_s22, 16  ;;  %p909_p7 = scmp.lt.s32.totalorder %s208_s22, %s1155_s28 }
  0xfc   :  { %p905_p6 = scmp.ne.s32.totalorder %s208_s22, %s904_s18  ;;  %p910_p8 = scmp.lt.s32.totalorder %s1181_s23, %s904_s18 }
  0xfe   :  { %p911_p9 = por %p910_p8, %p909_p7 }
 0x100   :  { %p912_p10 = pnand %p911_p9, %p905_p6 }
 0x102   :  { %915 = shalt.err (!%p912_p10)  }
 0x103   :  { %210 = dma.hbm_to_vmem [thread:$0]  %s197_s7, 16, %s208_s22, [#allocation3 + $0xa] }
 0x104   :  { %s585_s20 = sshll.u32 %s1322_s8, 4  ;;  %s1107_s25 = smov [#allocation2 + $0xc]  }
 0x105   :  { %s241_s26 = sshll.u32 %s1107_s25, 4  ;;  %s214_s29 = scalar_lea.hbm %s1454_s5, %s585_s20  ;;  %s1342_s26 = int_to_ptr.vmem [resolvable:$true] %s241_s26 }
 0x106   :  { %s916_s0 = scalar_lea.hbm %s214_s29, 16  ;;  %p919_p12 = scmp.lt.u32.totalorder %s214_s29, %s1454_s5 }
 0x107   :  { %p917_p11 = scmp.ne.s32.totalorder %s214_s29, %s916_s0  ;;  %p920_p13 = scmp.lt.u32.totalorder %s1172_s19, %s916_s0 }
 0x108   :  { %p922_p1 = scmp.lt.u32.totalorder %s916_s0, %s214_s29 }
 0x109   :  { %p921_p0 = por %p920_p13, %p919_p12 }
 0x10b   :  { %p923_p2 = por %p922_p1, %p921_p0 }
 0x10d   :  { %p924_p3 = pnand %p923_p2, %p917_p11 }
 0x10f   :  { %927 = shalt.err (!%p924_p3)  }
 0x110   :  { %s928_s22 = scalar_lea.vmem %s1327_s13, 16  ;;  %p933_p5 = scmp.lt.s32.totalorder %s1327_s13, %s1155_s28 }
 0x111   :  { %p929_p4 = scmp.ne.s32.totalorder %s1327_s13, %s928_s22  ;;  %p934_p6 = scmp.lt.s32.totalorder %s1181_s23, %s928_s22 }
 0x113   :  { %p935_p7 = por %p934_p6, %p933_p5 }
 0x115   :  { %p936_p8 = pnand %p935_p7, %p929_p4 }
 0x117   :  { %939 = shalt.err (!%p936_p8)  }
 0x118   :  { %227 = dma.hbm_to_vmem [thread:$0]  %s214_s29, 16, %s1327_s13, [#allocation3 + $0xb] }
 0x119   :  { %s587_s8 = sshll.u32 %s1324_s15, 4  ;;  %s1355_s11 = sld [smem:[#allocation5 + $0xd]] }
 0x11a   :  { %s231_s30 = scalar_lea.hbm %s1454_s5, %s587_s8 }
 0x11b   :  { %s940_s7 = scalar_lea.hbm %s231_s30, 16  ;;  %p943_p10 = scmp.lt.u32.totalorder %s231_s30, %s1454_s5 }
 0x11c   :  { %p941_p9 = scmp.ne.s32.totalorder %s231_s30, %s940_s7  ;;  %p944_p11 = scmp.lt.u32.totalorder %s1172_s19, %s940_s7 }
 0x11d   :  { %p946_p13 = scmp.lt.u32.totalorder %s940_s7, %s231_s30 }
 0x11e   :  { %p945_p12 = por %p944_p11, %p943_p10 }
 0x120   :  { %p947_p0 = por %p946_p13, %p945_p12 }
 0x122   :  { %p948_p1 = pnand %p947_p0, %p941_p9 }
 0x124   :  { %951 = shalt.err (!%p948_p1)  }
 0x125   :  { %s952_s13 = scalar_lea.vmem %s1342_s26, 16  ;;  %p957_p3 = scmp.lt.s32.totalorder %s1342_s26, %s1155_s28 }
 0x126   :  { %p953_p2 = scmp.ne.s32.totalorder %s1342_s26, %s952_s13  ;;  %p958_p4 = scmp.lt.s32.totalorder %s1181_s23, %s952_s13 }
 0x128   :  { %p959_p5 = por %p958_p4, %p957_p3 }
 0x12a   :  { %p960_p6 = pnand %p959_p5, %p953_p2 }
 0x12c   :  { %963 = shalt.err (!%p960_p6)  }
 0x12d   :  { %244 = dma.hbm_to_vmem [thread:$0]  %s231_s30, 16, %s1342_s26, [#allocation3 + $0xc] }
 0x12e   :  { %s1108_s15 = smov [#allocation2 + $0xd]   ;;  %s1370_s18 = sld [smem:[#allocation5 + $0xe]] }
 0x12f   :  { %s258_s14 = sshll.u32 %s1108_s15, 4  ;;  %s1109_s20 = smov [#allocation2 + $0xe]   ;;  %s259_s14 = int_to_ptr.vmem [resolvable:$true] %s258_s14 }
 0x130   :  { %s275_s25 = sshll.u32 %s1109_s20, 4  ;;  %s1372_s27 = sld [smem:[#allocation5 + $0xf]]  ;;  %s1375_s25 = int_to_ptr.vmem [resolvable:$true] %s275_s25 }
 0x131   :  { %s589_s9 = sshll.u32 %s1355_s11, 4 }
 0x132   :  { %s248_s21 = scalar_lea.hbm %s1454_s5, %s589_s9 }
 0x133   :  { %s964_s24 = scalar_lea.hbm %s248_s21, 16  ;;  %p967_p8 = scmp.lt.u32.totalorder %s248_s21, %s1454_s5 }
 0x134   :  { %p965_p7 = scmp.ne.s32.totalorder %s248_s21, %s964_s24  ;;  %p968_p9 = scmp.lt.u32.totalorder %s1172_s19, %s964_s24 }
 0x135   :  { %p970_p11 = scmp.lt.u32.totalorder %s964_s24, %s248_s21 }
 0x136   :  { %p969_p10 = por %p968_p9, %p967_p8 }
 0x138   :  { %p971_p12 = por %p970_p11, %p969_p10 }
 0x13a   :  { %p972_p13 = pnand %p971_p12, %p965_p7 }
 0x13c   :  { %975 = shalt.err (!%p972_p13)  }
 0x13d   :  { %s976_s8 = scalar_lea.vmem %s259_s14, 16  ;;  %p981_p1 = scmp.lt.s32.totalorder %s259_s14, %s1155_s28 }
 0x13e   :  { %p977_p0 = scmp.ne.s32.totalorder %s259_s14, %s976_s8  ;;  %p982_p2 = scmp.lt.s32.totalorder %s1181_s23, %s976_s8 }
 0x140   :  { %p983_p3 = por %p982_p2, %p981_p1 }
 0x142   :  { %p984_p4 = pnand %p983_p3, %p977_p0 }
 0x144   :  { %987 = shalt.err (!%p984_p4)  }
 0x145   :  { %261 = dma.hbm_to_vmem [thread:$0]  %s248_s21, 16, %s259_s14, [#allocation3 + $0xd] }
 0x146   :  { %s591_s11 = sshll.u32 %s1370_s18, 4  ;;  %s1110_s16 = smov [#allocation2 + $0xf]  }
 0x147   :  { %s292_s17 = sshll.u32 %s1110_s16, 4  ;;  %s265_s12 = scalar_lea.hbm %s1454_s5, %s591_s11  ;;  %s1390_s17 = int_to_ptr.vmem [resolvable:$true] %s292_s17 }
 0x148   :  { %s988_s10 = scalar_lea.hbm %s265_s12, 16  ;;  %p991_p6 = scmp.lt.u32.totalorder %s265_s12, %s1454_s5 }
 0x149   :  { %p989_p5 = scmp.ne.s32.totalorder %s265_s12, %s988_s10  ;;  %p992_p7 = scmp.lt.u32.totalorder %s1172_s19, %s988_s10 }
 0x14a   :  { %p994_p9 = scmp.lt.u32.totalorder %s988_s10, %s265_s12 }
 0x14b   :  { %p993_p8 = por %p992_p7, %p991_p6 }
 0x14d   :  { %p995_p10 = por %p994_p9, %p993_p8 }
 0x14f   :  { %p996_p11 = pnand %p995_p10, %p989_p5 }
 0x151   :  { %999 = shalt.err (!%p996_p11)  }
 0x152   :  { %s1000_s14 = scalar_lea.vmem %s1375_s25, 16  ;;  %p1005_p13 = scmp.lt.s32.totalorder %s1375_s25, %s1155_s28 }
 0x153   :  { %p1001_p12 = scmp.ne.s32.totalorder %s1375_s25, %s1000_s14  ;;  %p1006_p0 = scmp.lt.s32.totalorder %s1181_s23, %s1000_s14 }
 0x155   :  { %p1007_p1 = por %p1006_p0, %p1005_p13 }
 0x157   :  { %p1008_p2 = pnand %p1007_p1, %p1001_p12 }
 0x159   :  { %1011 = shalt.err (!%p1008_p2)  }
 0x15a   :  { %278 = dma.hbm_to_vmem [thread:$0]  %s265_s12, 16, %s1375_s25, [#allocation3 + $0xe] }
 0x15b   :  { %s593_s18 = sshll.u32 %s1372_s27, 4 }
 0x15c   :  { %s282_s29 = scalar_lea.hbm %s1454_s5, %s593_s18 }
 0x15d   :  { %s1012_s0 = scalar_lea.hbm %s282_s29, 16  ;;  %p1015_p4 = scmp.lt.u32.totalorder %s282_s29, %s1454_s5 }
 0x15e   :  { %p1013_p3 = scmp.ne.s32.totalorder %s282_s29, %s1012_s0  ;;  %p1016_p5 = scmp.lt.u32.totalorder %s1172_s19, %s1012_s0 }
 0x15f   :  { %p1018_p7 = scmp.lt.u32.totalorder %s1012_s0, %s282_s29 }
 0x160   :  { %p1017_p6 = por %p1016_p5, %p1015_p4 }
 0x162   :  { %p1019_p8 = por %p1018_p7, %p1017_p6 }
 0x164   :  { %p1020_p9 = pnand %p1019_p8, %p1013_p3 }
 0x166   :  { %1023 = shalt.err (!%p1020_p9)  }
 0x167   :  { %s1024_s25 = scalar_lea.vmem %s1390_s17, 16  ;;  %p1029_p11 = scmp.lt.s32.totalorder %s1390_s17, %s1155_s28 }
 0x168   :  { %p1025_p10 = scmp.ne.s32.totalorder %s1390_s17, %s1024_s25  ;;  %p1030_p12 = scmp.lt.s32.totalorder %s1181_s23, %s1024_s25 }
 0x16a   :  { %p1031_p13 = por %p1030_p12, %p1029_p11 }
 0x16c   :  { %p1032_p0 = pnand %p1031_p13, %p1025_p10 }
 0x16e   :  { %1035 = shalt.err (!%p1032_p0)  }
 0x16f   :  { %295 = dma.hbm_to_vmem [thread:$0]  %s282_s29, 16, %s1390_s17, [#allocation3 + $0xf] }
 0x170   :  { %1060 = dma.done.wait [#allocation3], 16 }
 0x171   :  { %1061 = vsyncadd [#allocation3], 4294967280 }
 0x172   :  { %1062 = dma.done.wait [#allocation3 + $0x1], 16 }
 0x173   :  { %1063 = vsyncadd [#allocation3 + $0x1], 4294967280 }
 0x174   :  { %1064 = dma.done.wait [#allocation3 + $0x2], 16 }
 0x175   :  { %1065 = vsyncadd [#allocation3 + $0x2], 4294967280 }
 0x176   :  { %1066 = dma.done.wait [#allocation3 + $0x3], 16 }
 0x177   :  { %1067 = vsyncadd [#allocation3 + $0x3], 4294967280 }
 0x178   :  { %1068 = dma.done.wait [#allocation3 + $0x4], 16 }
 0x179   :  { %1069 = vsyncadd [#allocation3 + $0x4], 4294967280 }
 0x17a   :  { %1070 = dma.done.wait [#allocation3 + $0x5], 16 }
 0x17b   :  { %1071 = vsyncadd [#allocation3 + $0x5], 4294967280 }
 0x17c   :  { %1072 = dma.done.wait [#allocation3 + $0x6], 16 }
 0x17d   :  { %1073 = vsyncadd [#allocation3 + $0x6], 4294967280 }
 0x17e   :  { %1074 = dma.done.wait [#allocation3 + $0x7], 16 }
 0x17f   :  { %1075 = vsyncadd [#allocation3 + $0x7], 4294967280 }
 0x180   :  { %1076 = dma.done.wait [#allocation3 + $0x8], 16 }
 0x181   :  { %1077 = vsyncadd [#allocation3 + $0x8], 4294967280 }
 0x182   :  { %1078 = dma.done.wait [#allocation3 + $0x9], 16 }
 0x183   :  { %1079 = vsyncadd [#allocation3 + $0x9], 4294967280 }
 0x184   :  { %1080 = dma.done.wait [#allocation3 + $0xa], 16 }
 0x185   :  { %1081 = vsyncadd [#allocation3 + $0xa], 4294967280 }
 0x186   :  { %1082 = dma.done.wait [#allocation3 + $0xb], 16 }
 0x187   :  { %1083 = vsyncadd [#allocation3 + $0xb], 4294967280 }
 0x188   :  { %1084 = dma.done.wait [#allocation3 + $0xc], 16 }
 0x189   :  { %1085 = vsyncadd [#allocation3 + $0xc], 4294967280 }
 0x18a   :  { %1086 = dma.done.wait [#allocation3 + $0xd], 16 }
 0x18b   :  { %1087 = vsyncadd [#allocation3 + $0xd], 4294967280 }
 0x18c   :  { %1088 = dma.done.wait [#allocation3 + $0xe], 16 }
 0x18d   :  { %1089 = vsyncadd [#allocation3 + $0xe], 4294967280 }
 0x18e   :  { %1090 = dma.done.wait [#allocation3 + $0xf], 16 }
 0x18f   :  { %1091 = vsyncadd [#allocation3 + $0xf], 4294967280  ;;  %v1111_v0 = vmov 0   ;;  %v331_v1 = vld [vmem:[%s1450_s1] sm:$0xff]  ;;  %v332_v2 = vld [vmem:[%s1450_s1 + $0x8] sm:$0xff]  ;;  %s1112_s30 = smov [#allocation6]  }
 0x190   :  { %635 = vset.pattern.permute.xlu0 %v1111_v0  ;;  %vm333_vm0 = vcmp.eq.s32.totalorder %v331_v1, 0  ;;  %vm334_vm1 = vcmp.eq.s32.totalorder %v332_v2, 0  ;;  %v594_v5 = vld [vmem:[%s1452_s3] ss:$0 sm:$0xff]  ;;  %v595_v6 = vld [vmem:[%s1452_s3 + $0x1] ss:$0 sm:$0xff] }
 0x191   :  { %v337_v3 = vsel %vm333_vm0, 1, %v1111_v0  ;;  %v338_v4 = vsel %vm334_vm1, 1, %v1111_v0  ;;  %v329_v8 = vld [vmem:[#allocation2] sm:$0xff]  ;;  %v330_v13 = vld [vmem:[#allocation2 + $0x8] sm:$0xff]  ;;  %s409_s7 = sshll.u32 %s1112_s30, 4  ;;  %s410_s7 = int_to_ptr.vmem [resolvable:$true] %s409_s7 }
 0x192   :  { %340 = vperm.xlu0 %635, %v337_v3   ;;  %v357_v10 = vld [vmem:[%s1451_s2] sm:$0xff]  ;;  %s1036_s12 = scalar_lea.vmem %s410_s7, 256  ;;  %p1041_p2 = scmp.lt.s32.totalorder %s410_s7, %s410_s7 }
 0x193   :  { %v596_v36 = vld [vmem:[%s1453_s4] ss:$0 sm:$0xff]  ;;  %v597_v38 = vld [vmem:[%s1453_s4 + $0x1] ss:$0 sm:$0xff]  ;;  %p1037_p1 = scmp.ne.s32.totalorder %s410_s7, %s1036_s12  ;;  %p1042_p3 = scmp.lt.s32.totalorder %s1036_s12, %s1036_s12 }
 0x195   :  { %p1043_p4 = por %p1042_p3, %p1041_p2 }
 0x196   :  { %343 = vperm.xlu0 %635, %v338_v4  }
 0x197   :  { %p1044_p5 = pnand %p1043_p4, %p1037_p1 }
 0x211   :  { %v341_v7 = vpop.permute.xlu0 %340 }
 0x212   :  { %vm345_vm2 = vcmp.eq.s32.totalorder %v341_v7, 1 }
 0x213   :  { %v355_v9 = vsel %vm345_vm2, %v594_v5, %v595_v6 }
 0x214   :  { %v358_v11 = vadd.f32 %v355_v9, %v329_v8 }
 0x215   :  { %v344_v12 = vpop.permute.xlu0 %343 }
 0x216   :  { %vm346_vm3 = vcmp.eq.s32.totalorder %v344_v12, 1  ;;  %v360_v14 = vadd.f32 %v358_v11, %v357_v10 }
 0x217   :  { %v356_v15 = vsel %vm346_vm3, %v594_v5, %v595_v6 }
 0x218   :  { %v359_v16 = vadd.f32 %v356_v15, %v330_v13  ;;  %362 = vadd.xlane.f32.xlu1 %v360_v14  ;;  %v366_v17 = vmul.f32 %v360_v14, %v360_v14 }
 0x21a   :  { %368 = vadd.xlane.f32.xlu0 %v366_v17  ;;  %v361_v18 = vadd.f32 %v359_v16, %v357_v10 }
 0x21c   :  { %364 = vadd.xlane.f32.xlu1 %v361_v18  ;;  %v367_v19 = vmul.f32 %v361_v18, %v361_v18 }
 0x220   :  { %370 = vadd.xlane.f32.xlu1 %v367_v19 }
 0x2a5   :  { %v363_v20 = vpop.xlane.xlu1 %362 }
 0x2a6   :  { %v372_v21 = vmul.f32 0.0078125, %v363_v20 }
 0x2a7   :  { %v369_v22 = vpop.xlane.xlu0 %368 }
 0x2a8   :  { %v376_v23 = vmul.f32 %v372_v21, %v372_v21  ;;  %v374_v24 = vmul.f32 0.0078125, %v369_v22  ;;  %v380_v34 = vsub.f32 %v360_v14, %v372_v21 }
 0x2a9   :  { %v365_v25 = vpop.xlane.xlu1 %364 }
 0x2aa   :  { %v378_v26 = vsub.f32 %v374_v24, %v376_v23  ;;  %v373_v27 = vmul.f32 0.0078125, %v365_v25 }
 0x2ac   :  { %v382_v28 = vadd.f32 1e-12, %v378_v26  ;;  %v377_v30 = vmul.f32 %v373_v27, %v373_v27  ;;  %v381_v40 = vsub.f32 %v361_v18, %v373_v27 }
 0x2ad   :  { %v371_v29 = vpop.xlane.xlu1 %370 }
 0x2ae   :  { %636 = vrsqrt.f32 %v382_v28  ;;  %v375_v31 = vmul.f32 0.0078125, %v371_v29 }
 0x2b0   :  { %v379_v32 = vsub.f32 %v375_v31, %v377_v30 }
 0x2b2   :  { %v383_v33 = vadd.f32 1e-12, %v379_v32 }
 0x2b4   :  { %638 = vrsqrt.f32 %v383_v33 }
 0x2b8   :  { %v637_v35 = vpop.eup %636 }
 0x2b9   :  { %v386_v37 = vmul.f32 %v637_v35, %v380_v34 }
 0x2bb   :  { %v393_v39 = vmul.f32 %v596_v36, %v386_v37 }
 0x2bd   :  { %v400_v41 = vadd.f32 %v597_v38, %v393_v39 }
 0x2be   :  { %v639_v42 = vpop.eup %638 }
 0x2bf   :  { %v387_v43 = vmul.f32 %v639_v42, %v381_v40  ;;  %402 = vst [vmem:[#allocation6] sm:$0xff] %v400_v41 }
 0x2c1   :  { %v394_v44 = vmul.f32 %v596_v36, %v387_v43 }
 0x2c3   :  { %v401_v45 = vadd.f32 %v597_v38, %v394_v44 }
 0x2c5   :  { %403 = vst [vmem:[#allocation6 + $0x8] sm:$0xff] %v401_v45 }
 0x2c6   :  { %1047 = shalt.err (!%p1044_p5)
}
 0x2c7   :  { %s1048_s13 = scalar_lea.hbm %s1455_s6, 256 }
 0x2c8   :  { %p1049_p6 = scmp.ne.s32.totalorder %s1455_s6, %s1048_s13  ;;  %p1052_p7 = scmp.lt.u32.totalorder %s1048_s13, %s1455_s6 }
 0x2ca   :  { %p1054_p8 = pnand %p1052_p7, %p1049_p6 }
 0x2cc   :  { %1057 = shalt.err (!%p1054_p8)
}
 0x2cd   :  { %s1113_s9 = smov 128   ;;  %s1114_s29 = smov 8  }
 0x2ce   :  { %415 = dma.vmem_to_hbm [thread:$0]  %s410_s7, 256, %s1455_s6, [#allocation7], %s1113_s9, %s1113_s9, %s1114_s29  }
 0x2cf   :  { %1092 = dma.done.wait [#allocation7], 256  }
 0x2d0   :  { %1093 = vsyncadd [#allocation7], 4294967040 }
 0x2d1   :  { %419 = vsyncpa [#allocation7], 1 }
 0x2d2   :  { %420 = vsyncmov [#allocation3] }
 0x2d5   :  { %s421_s24 = vpop.sfrf %420 }
 0x2d6   :  { %p598_p9 = scmp.ne.s32.totalorder %s421_s24, 0 }
 0x2d8   :  { %425 = shalt.err (%p598_p9)  }
 0x2d9   :  { %427 = vsyncmov [#allocation3 + $0x1] }
 0x2dc   :  { %s428_s25 = vpop.sfrf %427 }
 0x2dd   :  { %p599_p10 = scmp.ne.s32.totalorder %s428_s25, 0 }
 0x2df   :  { %432 = shalt.err (%p599_p10)  }
 0x2e0   :  { %434 = vsyncmov [#allocation3 + $0x2] }
 0x2e3   :  { %s435_s5 = vpop.sfrf %434 }
 0x2e4   :  { %p600_p11 = scmp.ne.s32.totalorder %s435_s5, 0 }
 0x2e6   :  { %439 = shalt.err (%p600_p11)  }
 0x2e7   :  { %441 = vsyncmov [#allocation3 + $0x3] }
 0x2ea   :  { %s442_s28 = vpop.sfrf %441 }
 0x2eb   :  { %p601_p12 = scmp.ne.s32.totalorder %s442_s28, 0 }
 0x2ed   :  { %446 = shalt.err (%p601_p12)  }
 0x2ee   :  { %448 = vsyncmov [#allocation3 + $0x4] }
 0x2f1   :  { %s449_s6 = vpop.sfrf %448 }
 0x2f2   :  { %p602_p13 = scmp.ne.s32.totalorder %s449_s6, 0 }
 0x2f4   :  { %453 = shalt.err (%p602_p13)  }
 0x2f5   :  { %455 = vsyncmov [#allocation3 + $0x5] }
 0x2f8   :  { %s456_s19 = vpop.sfrf %455 }
 0x2f9   :  { %p603_p0 = scmp.ne.s32.totalorder %s456_s19, 0 }
 0x2fb   :  { %460 = shalt.err (%p603_p0)  }
 0x2fc   :  { %462 = vsyncmov [#allocation3 + $0x6] }
 0x2ff   :  { %s463_s23 = vpop.sfrf %462 }
 0x300   :  { %p604_p1 = scmp.ne.s32.totalorder %s463_s23, 0 }
 0x302   :  { %467 = shalt.err (%p604_p1)  }
 0x303   :  { %469 = vsyncmov [#allocation3 + $0x7] }
 0x306   :  { %s470_s27 = vpop.sfrf %469 }
 0x307   :  { %p605_p2 = scmp.ne.s32.totalorder %s470_s27, 0 }
 0x309   :  { %474 = shalt.err (%p605_p2)  }
 0x30a   :  { %476 = vsyncmov [#allocation3 + $0x8] }
 0x30d   :  { %s477_s22 = vpop.sfrf %476 }
 0x30e   :  { %p606_p3 = scmp.ne.s32.totalorder %s477_s22, 0 }
 0x310   :  { %481 = shalt.err (%p606_p3)  }
 0x311   :  { %483 = vsyncmov [#allocation3 + $0x9] }
 0x314   :  { %s484_s26 = vpop.sfrf %483 }
 0x315   :  { %p607_p4 = scmp.ne.s32.totalorder %s484_s26, 0 }
 0x317   :  { %488 = shalt.err (%p607_p4)  }
 0x318   :  { %490 = vsyncmov [#allocation3 + $0xa] }
 0x31b   :  { %s491_s8 = vpop.sfrf %490 }
 0x31c   :  { %p608_p5 = scmp.ne.s32.totalorder %s491_s8, 0 }
 0x31e   :  { %495 = shalt.err (%p608_p5)  }
 0x31f   :  { %497 = vsyncmov [#allocation3 + $0xb] }
 0x322   :  { %s498_s11 = vpop.sfrf %497 }
 0x323   :  { %p609_p6 = scmp.ne.s32.totalorder %s498_s11, 0 }
 0x325   :  { %502 = shalt.err (%p609_p6)  }
 0x326   :  { %504 = vsyncmov [#allocation3 + $0xc] }
 0x329   :  { %s505_s1 = vpop.sfrf %504 }
 0x32a   :  { %p610_p7 = scmp.ne.s32.totalorder %s505_s1, 0 }
 0x32c   :  { %509 = shalt.err (%p610_p7)  }
 0x32d   :  { %511 = vsyncmov [#allocation3 + $0xd] }
 0x330   :  { %s512_s2 = vpop.sfrf %511 }
 0x331   :  { %p611_p8 = scmp.ne.s32.totalorder %s512_s2, 0 }
 0x333   :  { %516 = shalt.err (%p611_p8)  }
 0x334   :  { %518 = vsyncmov [#allocation3 + $0xe] }
 0x337   :  { %s519_s3 = vpop.sfrf %518 }
 0x338   :  { %p612_p9 = scmp.ne.s32.totalorder %s519_s3, 0 }
 0x33a   :  { %523 = shalt.err (%p612_p9)  }
 0x33b   :  { %525 = vsyncmov [#allocation3 + $0xf] }
 0x33e   :  { %s526_s16 = vpop.sfrf %525 }
 0x33f   :  { %p613_p10 = scmp.ne.s32.totalorder %s526_s16, 0 }
 0x341   :  { %530 = shalt.err (%p613_p10)  }

</bundles_post_ra>
